<compile_context>
chip_gen: v7x
topology: tpu7x:2x2x1
jax: 0.10.0
libtpu: 0.0.40
codegen_flags: <defaults>
</compile_context>

<pallas_src>
import functools

import jax
import jax.numpy as jnp
from jax.experimental import pallas as pl
from jax.experimental.pallas import tpu as pltpu


# ----------------------------------------------------------------------------
# Weight preparation: 3x3 conv kernel -> 4 parities x 4 taps of 1x1 kernels
# ----------------------------------------------------------------------------
# out[2i+di, 2j+dj] = sum_{a,b in {0,1}} E[di,dj,a,b] . x[i-1+di+a, j-1+dj+b]
# with E[di,dj,a,b] = sum_{kh in TAPS[di][a], kw in TAPS[dj][b]} W[:, :, kh, kw]
_TAP_SETS = (((0,), (1, 2)),        # parity 0: a=0 -> {kh=0}, a=1 -> {kh=1,2}
             ((0, 1), (2,)))        # parity 1: a=0 -> {kh=0,1}, a=1 -> {kh=2}


def _subpixel_weights(w_oihw, scale):
    """(C_out,C_in,3,3) -> (4, 4, C_in, C_out); BN per-channel scale folded in.

    Index [2*di+dj, 2*a+b] holds the (C_in, C_out) kernel for output parity
    (di, dj) and input tap (a, b)."""
    w = jnp.transpose(w_oihw, (2, 3, 1, 0)) * scale       # (3,3,C_in,C_out)
    per_parity = []
    for di in (0, 1):
        for dj in (0, 1):
            taps = []
            for a in (0, 1):
                for b in (0, 1):
                    e = sum(w[kh, kw]
                            for kh in _TAP_SETS[di][a]
                            for kw in _TAP_SETS[dj][b])    # (C_in, C_out)
                    taps.append(e)
            per_parity.append(jnp.stack(taps, axis=0))     # (4, C_in, C_out)
    return jnp.stack(per_parity, axis=0)                   # (4, 4, C_in, C_out)


# ----------------------------------------------------------------------------
# Fused upsample2x + conv3x3 + BatchNorm + ReLU kernel
# ----------------------------------------------------------------------------
def _upconv_kernel(x_ref, top_ref, bot_ref, w_ref, shift_ref, o_ref, *,
                   r_blk, w_img, c_in, c_out):
    """One grid step: coarse rows [t*R, t*R+R) -> 2R output rows, all cols.

    x_ref     : (1, R, W, C_in)            main rows (unpadded input)
    top_ref   : (1, 1, W, C_in)            row t*R-1 (clamped; zeroed at t==0)
    bot_ref   : (1, 1, W, C_in)            row t*R+R (clamped; zeroed at last t)
    w_ref     : (4, 4, C_in, C_out)  bf16  per-parity/per-tap kernels (BN scale folded)
    shift_ref : (1, C_out)           f32   folded BN shift (+conv bias)
    o_ref     : (1, 1, R, 2, W, 2*C_out)   row parity on the inner '2' axis,
                                           column parity packed into channels
    """
    t = pl.program_id(1)
    bf = jnp.bfloat16

    main = x_ref[0].astype(bf)                                   # (R, W, C_in)
    top = top_ref[0].astype(bf) * (t > 0).astype(bf)             # zero top pad
    bot = bot_ref[0].astype(bf) * (t < pl.num_programs(1) - 1).astype(bf)
    rows = jnp.concatenate([top, main, bot], axis=0)             # (R+2, W, C_in)

    # The three column-shifted windows (the conv's pad=1 built in VMEM).
    zcol = jnp.zeros((r_blk + 2, 1, c_in), bf)
    cwin = (jnp.concatenate([zcol, rows[:, :w_img - 1, :]], axis=1),  # cols j-1
            rows,                                                     # cols j
            jnp.concatenate([rows[:, 1:, :], zcol], axis=1))          # cols j+1

    shift = shift_ref[...]                                        # (1, C_out)
    m = r_blk * w_img
    for di in (0, 1):
        cols = []
        for dj in (0, 1):
            acc = jnp.zeros((m, c_out), jnp.float32)
            for a in (0, 1):
                for b in (0, 1):
                    patch = cwin[dj + b][di + a:di + a + r_blk].reshape(m, c_in)
                    acc = acc + jnp.dot(patch, w_ref[2 * di + dj, 2 * a + b],
                                        preferred_element_type=jnp.float32)
            cols.append(jnp.maximum(acc + shift, 0.0).astype(o_ref.dtype))
        # Column parities packed along channels: (R, W, 2*C_out); row parity di
        # stored directly into its slot of the output block (no stack/copy).
        y = jnp.concatenate(cols, axis=-1).reshape(r_blk, w_img, 2 * c_out)
        o_ref[0, 0, :, di] = y


# ----------------------------------------------------------------------------
# Row-block selection (big M, VMEM-aware, >= 2 grid steps for v7x dual-TC)
# ----------------------------------------------------------------------------
def _step_vmem_bytes(r, w, c_in, c_out, in_bytes, out_bytes):
    in_blk = (r + 2) * w * c_in * in_bytes                  # main + 2 halo rows
    out_blk = 2 * r * w * 2 * c_out * out_bytes
    weights = 16 * c_in * c_out * 2
    interm = 3 * (r + 2) * w * c_in * 2 + 3 * r * w * c_out * 4
    return 2 * (in_blk + out_blk) + weights + interm        # double-buffered I/O


def _pick_row_block(n, h, w, c_in, c_out, in_bytes, out_bytes,
                    vmem_budget=28 * 1024 * 1024, target_m=2048):
    divisors = [r for r in range(1, h + 1) if h % r == 0]
    best = divisors[0]
    for r in divisors:
        t = h // r
        if n * t < 2 and r > best:        # keep >= 2 parallel steps (v7x: 2 TCs)
            continue
        if _step_vmem_bytes(r, w, c_in, c_out, in_bytes, out_bytes) > vmem_budget:
            break
        best = r
        if r * w >= target_m:             # big enough M to amortize per-step cost
            break
    return best


# ----------------------------------------------------------------------------
# pallas_call wrapper (NHWC, no wrapper-side relayout / pad / cast passes)
# ----------------------------------------------------------------------------
def _up_conv_call(x_nhwc, w_sub, shift, *, out_dtype, row_block=None):
    n, h, w, c_in = x_nhwc.shape
    c_out = w_sub.shape[-1]
    r = row_block if row_block is not None else _pick_row_block(
        n, h, w, c_in, c_out,
        in_bytes=x_nhwc.dtype.itemsize,
        out_bytes=jnp.dtype(out_dtype).itemsize)
    assert h % r == 0, (h, r)
    t_steps = h // r

    kernel = functools.partial(_upconv_kernel, r_blk=r, w_img=w,
                               c_in=c_in, c_out=c_out)

    y = pl.pallas_call(
        kernel,
        out_shape=jax.ShapeDtypeStruct((n, t_steps, r, 2, w, 2 * c_out),
                                       out_dtype),
        grid_spec=pltpu.PrefetchScalarGridSpec(
            num_scalar_prefetch=0,
            grid=(n, t_steps),
            in_specs=[
                # main rows [t*R, t*R+R)
                pl.BlockSpec((1, r, w, c_in), lambda b, t: (b, t, 0, 0)),
                # top halo row t*R-1 (clamped; zeroed in-kernel at t==0)
                pl.BlockSpec((1, 1, w, c_in),
                             lambda b, t: (b, jnp.maximum(t * r - 1, 0), 0, 0)),
                # bottom halo row t*R+R (clamped; zeroed in-kernel at last t)
                pl.BlockSpec((1, 1, w, c_in),
                             lambda b, t: (b, jnp.minimum(t * r + r, h - 1), 0, 0)),
                # grid-invariant operands
                pl.BlockSpec((4, 4, c_in, c_out), lambda b, t: (0, 0, 0, 0)),
                pl.BlockSpec((1, c_out), lambda b, t: (0, 0)),
            ],
            out_specs=pl.BlockSpec((1, 1, r, 2, w, 2 * c_out),
                                   lambda b, t: (b, t, 0, 0, 0, 0)),
        ),
        compiler_params=pltpu.CompilerParams(
            dimension_semantics=("parallel", "parallel"),
            vmem_limit_bytes=48 * 1024 * 1024),
    )(x_nhwc, x_nhwc, x_nhwc, w_sub, shift)

    # (N, T, R, 2, W, 2*C_out) -> (N, 2H, 2W, C_out): pure row-major merge, free.
    return y.reshape(n, 2 * h, 2 * w, c_out)


def up_conv_nhwc(params, x_nhwc, *, out_dtype=jnp.bfloat16, row_block=None):
    """NHWC entry point (preferred for NHWC end-to-end models: no wrapper passes)."""
    eps = 1e-5
    scale = params["gamma"] * jax.lax.rsqrt(params["var"] + eps)
    shift = params["beta"] + scale * (params["b"] - params["mean"])
    w_sub = _subpixel_weights(params["w"], scale).astype(jnp.bfloat16)
    return _up_conv_call(x_nhwc, w_sub,
                         shift.reshape(1, -1).astype(jnp.float32),
                         out_dtype=out_dtype, row_block=row_block)


def up_conv_forward(params, x_nchw, *, out_dtype=jnp.float32, row_block=None):
    """PyTorch-facing forward: NCHW in, NCHW out (matches up_conv.forward).

    The NCHW<->NHWC relayouts below exist only to honor the NCHW interface;
    NHWC pipelines should call up_conv_nhwc directly and skip them."""
    x = jnp.transpose(x_nchw, (0, 2, 3, 1)).astype(jnp.bfloat16)  # fused pass
    y = up_conv_nhwc(params, x, out_dtype=jnp.bfloat16, row_block=row_block)
    return jnp.transpose(y, (0, 3, 1, 2)).astype(out_dtype)


# ----------------------------------------------------------------------------
# Pure-JAX reference (exact module math, f32) for validation
# ----------------------------------------------------------------------------
def up_conv_reference(params, x_nchw):
    u = jnp.repeat(jnp.repeat(x_nchw, 2, axis=2), 2, axis=3)   # nearest 2x
    y = jax.lax.conv_general_dilated(
        u, params["w"], window_strides=(1, 1), padding=((1, 1), (1, 1)),
        dimension_numbers=("NCHW", "OIHW", "NCHW"))
    y = y + params["b"][None, :, None, None]
    inv = params["gamma"] / jnp.sqrt(params["var"] + 1e-5)
    y = ((y - params["mean"][None, :, None, None]) * inv[None, :, None, None]
         + params["beta"][None, :, None, None])
    return jnp.maximum(y, 0.0)


# ----------------------------------------------------------------------------
if __name__ == "__main__":
    key = jax.random.PRNGKey(0)
    N, C_in, C_out, H, W = 2, 16, 32, 16, 16
    ks = jax.random.split(key, 7)

    params = {
        "w": jax.random.normal(ks[0], (C_out, C_in, 3, 3), jnp.float32) * 0.05,
        "b": jax.random.normal(ks[1], (C_out,), jnp.float32) * 0.05,
        # BatchNorm2d running-stat (eval) parameters, made non-trivial on purpose.
        "gamma": 1.0 + 0.1 * jax.random.normal(ks[2], (C_out,), jnp.float32),
        "beta": 0.1 * jax.random.normal(ks[3], (C_out,), jnp.float32),
        "mean": 0.1 * jax.random.normal(ks[4], (C_out,), jnp.float32),
        "var": jnp.abs(1.0 + 0.1 * jax.random.normal(ks[5], (C_out,), jnp.float32)),
    }
    x = jax.random.normal(ks[6], (N, C_in, H, W), jnp.float32)

    ref = up_conv_reference(params, x)
    ref_scale = float(jnp.max(jnp.abs(ref))) + 1e-6

    # Config 1: default (auto row block -> single row block per image).
    out = jax.jit(up_conv_forward)(params, x)
    jax.block_until_ready(out)
    assert out.shape == (N, C_out, 2 * H, 2 * W), out.shape
    assert bool(jnp.all(jnp.isfinite(out)))
    err = float(jnp.max(jnp.abs(out - ref))) / ref_scale
    assert err < 2e-2, err   # bf16 weights/activations/output, f32 accumulation

    # Config 2: forced smaller row block -> exercises interior halo rows (T > 1).
    out2 = jax.jit(functools.partial(up_conv_forward, row_block=4))(params, x)
    jax.block_until_ready(out2)
    err2 = float(jnp.max(jnp.abs(out2 - ref))) / ref_scale
    assert err2 < 2e-2, err2

    print("KERNEL_OK")
</pallas_src>

<mosaic_0001>
module attributes {stable_mosaic.version = 11 : i64} {
  func.func @_upconv_kernel(%arg0: i32, %arg1: i32, %arg2: memref<1x16x16x16xbf16, #tpu.memory_space<vmem>>, %arg3: memref<1x1x16x16xbf16, #tpu.memory_space<vmem>>, %arg4: memref<1x1x16x16xbf16, #tpu.memory_space<vmem>>, %arg5: memref<4x4x16x32xbf16, #tpu.memory_space<vmem>>, %arg6: memref<1x32xf32, #tpu.memory_space<vmem>>, %arg7: memref<1x1x16x2x16x64xbf16, #tpu.memory_space<vmem>>) attributes {dimension_semantics = [#tpu.dimension_semantics<parallel>, #tpu.dimension_semantics<parallel>], iteration_bounds = array<i64: 2, 1>, scalar_prefetch = 0 : i64, scratch_operands = 0 : i64, tpu.core_type = #tpu.core_type<tc>, window_params = [{transform_indices = @transform_0, window_bounds = array<i64: 1, 16, 16, 16>}, {transform_indices = @transform_1, window_bounds = array<i64: 1, 1, 16, 16>}, {transform_indices = @transform_2, window_bounds = array<i64: 1, 1, 16, 16>}, {pipeline_mode = #tpu.pipeline_mode<synchronous>, transform_indices = @transform_3, window_bounds = array<i64: 4, 4, 16, 32>}, {pipeline_mode = #tpu.pipeline_mode<synchronous>, transform_indices = @transform_4, window_bounds = array<i64: 1, 32>}, {transform_indices = @transform_5, window_bounds = array<i64: 1, 1, 16, 2, 16, 64>}]} {
    %c0 = arith.constant 0 : index
    %c0_0 = arith.constant 0 : index
    %c0_1 = arith.constant 0 : index
    %c0_2 = arith.constant 0 : index
    %0 = vector.load %arg2[%c0, %c0_0, %c0_1, %c0_2] : memref<1x16x16x16xbf16, #tpu.memory_space<vmem>>, vector<1x16x16x16xbf16>
    %1 = vector.shape_cast %0 : vector<1x16x16x16xbf16> to vector<16x16x16xbf16>
    %c0_3 = arith.constant 0 : index
    %c0_4 = arith.constant 0 : index
    %c0_5 = arith.constant 0 : index
    %c0_6 = arith.constant 0 : index
    %2 = vector.load %arg3[%c0_3, %c0_4, %c0_5, %c0_6] : memref<1x1x16x16xbf16, #tpu.memory_space<vmem>>, vector<1x1x16x16xbf16>
    %3 = vector.shape_cast %2 : vector<1x1x16x16xbf16> to vector<1x16x16xbf16>
    %c0_i32 = arith.constant 0 : i32
    %4 = arith.cmpi sgt, %arg1, %c0_i32 : i32
    %5 = arith.extui %4 : i1 to i32
    %6 = arith.sitofp %5 : i32 to f32
    %7 = arith.truncf %6 : f32 to bf16
    %8 = vector.broadcast %7 : bf16 to vector<1x16x16xbf16>
    %9 = arith.mulf %3, %8 : vector<1x16x16xbf16>
    %c0_7 = arith.constant 0 : index
    %c0_8 = arith.constant 0 : index
    %c0_9 = arith.constant 0 : index
    %c0_10 = arith.constant 0 : index
    %10 = vector.load %arg4[%c0_7, %c0_8, %c0_9, %c0_10] : memref<1x1x16x16xbf16, #tpu.memory_space<vmem>>, vector<1x1x16x16xbf16>
    %11 = vector.shape_cast %10 : vector<1x1x16x16xbf16> to vector<1x16x16xbf16>
    %c0_i32_11 = arith.constant 0 : i32
    %12 = arith.cmpi slt, %arg1, %c0_i32_11 : i32
    %13 = arith.extui %12 : i1 to i32
    %14 = arith.sitofp %13 : i32 to f32
    %15 = arith.truncf %14 : f32 to bf16
    %16 = vector.broadcast %15 : bf16 to vector<1x16x16xbf16>
    %17 = arith.mulf %11, %16 : vector<1x16x16xbf16>
    %18 = tpu.concatenate %9, %1, %17 in 0 : vector<1x16x16xbf16>, vector<16x16x16xbf16>, vector<1x16x16xbf16> -> vector<18x16x16xbf16>
    %cst = arith.constant 0.000000e+00 : bf16
    %19 = vector.broadcast %cst : bf16 to vector<18x1x16xbf16>
    %20 = vector.extract_strided_slice %18 {offsets = [0, 0, 0], sizes = [18, 15, 16], strides = [1, 1, 1]} : vector<18x16x16xbf16> to vector<18x15x16xbf16>
    %21 = tpu.concatenate %19, %20 in 1 : vector<18x1x16xbf16>, vector<18x15x16xbf16> -> vector<18x16x16xbf16>
    %22 = vector.extract_strided_slice %18 {offsets = [0, 1, 0], sizes = [18, 15, 16], strides = [1, 1, 1]} : vector<18x16x16xbf16> to vector<18x15x16xbf16>
    %23 = tpu.concatenate %22, %19 in 1 : vector<18x15x16xbf16>, vector<18x1x16xbf16> -> vector<18x16x16xbf16>
    %c0_12 = arith.constant 0 : index
    %c0_13 = arith.constant 0 : index
    %24 = vector.load %arg6[%c0_12, %c0_13] : memref<1x32xf32, #tpu.memory_space<vmem>>, vector<1x32xf32>
    %cst_14 = arith.constant 0.000000e+00 : f32
    %25 = vector.broadcast %cst_14 : f32 to vector<256x32xf32>
    %26 = vector.extract_strided_slice %21 {offsets = [0, 0, 0], sizes = [16, 16, 16], strides = [1, 1, 1]} : vector<18x16x16xbf16> to vector<16x16x16xbf16>
    %27 = vector.shape_cast %26 : vector<16x16x16xbf16> to vector<256x16xbf16>
    %c0_15 = arith.constant 0 : index
    %c0_16 = arith.constant 0 : index
    %c0_17 = arith.constant 0 : index
    %c0_18 = arith.constant 0 : index
    %28 = vector.load %arg5[%c0_15, %c0_16, %c0_17, %c0_18] : memref<4x4x16x32xbf16, #tpu.memory_space<vmem>>, vector<1x1x16x32xbf16>
    %29 = vector.shape_cast %28 : vector<1x1x16x32xbf16> to vector<16x32xbf16>
    %cst_19 = arith.constant dense<0.000000e+00> : vector<256x32xf32>
    %30 = tpu.matmul %27, %29, %cst_19 {dimension_numbers = #tpu.dot_dimension_numbers<[1], [0], [0], [1], [0, 0, 1, 1], [], []>} : vector<256x16xbf16>, vector<16x32xbf16>, vector<256x32xf32> -> vector<256x32xf32>
    %31 = arith.addf %25, %30 : vector<256x32xf32>
    %32 = vector.extract_strided_slice %18 {offsets = [0, 0, 0], sizes = [16, 16, 16], strides = [1, 1, 1]} : vector<18x16x16xbf16> to vector<16x16x16xbf16>
    %33 = vector.shape_cast %32 : vector<16x16x16xbf16> to vector<256x16xbf16>
    %c0_20 = arith.constant 0 : index
    %c1 = arith.constant 1 : index
    %c0_21 = arith.constant 0 : index
    %c0_22 = arith.constant 0 : index
    %34 = vector.load %arg5[%c0_20, %c1, %c0_21, %c0_22] : memref<4x4x16x32xbf16, #tpu.memory_space<vmem>>, vector<1x1x16x32xbf16>
    %35 = vector.shape_cast %34 : vector<1x1x16x32xbf16> to vector<16x32xbf16>
    %cst_23 = arith.constant dense<0.000000e+00> : vector<256x32xf32>
    %36 = tpu.matmul %33, %35, %cst_23 {dimension_numbers = #tpu.dot_dimension_numbers<[1], [0], [0], [1], [0, 0, 1, 1], [], []>} : vector<256x16xbf16>, vector<16x32xbf16>, vector<256x32xf32> -> vector<256x32xf32>
    %37 = arith.addf %31, %36 : vector<256x32xf32>
    %38 = vector.extract_strided_slice %21 {offsets = [1, 0, 0], sizes = [16, 16, 16], strides = [1, 1, 1]} : vector<18x16x16xbf16> to vector<16x16x16xbf16>
    %39 = vector.shape_cast %38 : vector<16x16x16xbf16> to vector<256x16xbf16>
    %c0_24 = arith.constant 0 : index
    %c2 = arith.constant 2 : index
    %c0_25 = arith.constant 0 : index
    %c0_26 = arith.constant 0 : index
    %40 = vector.load %arg5[%c0_24, %c2, %c0_25, %c0_26] : memref<4x4x16x32xbf16, #tpu.memory_space<vmem>>, vector<1x1x16x32xbf16>
    %41 = vector.shape_cast %40 : vector<1x1x16x32xbf16> to vector<16x32xbf16>
    %cst_27 = arith.constant dense<0.000000e+00> : vector<256x32xf32>
    %42 = tpu.matmul %39, %41, %cst_27 {dimension_numbers = #tpu.dot_dimension_numbers<[1], [0], [0], [1], [0, 0, 1, 1], [], []>} : vector<256x16xbf16>, vector<16x32xbf16>, vector<256x32xf32> -> vector<256x32xf32>
    %43 = arith.addf %37, %42 : vector<256x32xf32>
    %44 = vector.extract_strided_slice %18 {offsets = [1, 0, 0], sizes = [16, 16, 16], strides = [1, 1, 1]} : vector<18x16x16xbf16> to vector<16x16x16xbf16>
    %45 = vector.shape_cast %44 : vector<16x16x16xbf16> to vector<256x16xbf16>
    %c0_28 = arith.constant 0 : index
    %c3 = arith.constant 3 : index
    %c0_29 = arith.constant 0 : index
    %c0_30 = arith.constant 0 : index
    %46 = vector.load %arg5[%c0_28, %c3, %c0_29, %c0_30] : memref<4x4x16x32xbf16, #tpu.memory_space<vmem>>, vector<1x1x16x32xbf16>
    %47 = vector.shape_cast %46 : vector<1x1x16x32xbf16> to vector<16x32xbf16>
    %cst_31 = arith.constant dense<0.000000e+00> : vector<256x32xf32>
    %48 = tpu.matmul %45, %47, %cst_31 {dimension_numbers = #tpu.dot_dimension_numbers<[1], [0], [0], [1], [0, 0, 1, 1], [], []>} : vector<256x16xbf16>, vector<16x32xbf16>, vector<256x32xf32> -> vector<256x32xf32>
    %49 = arith.addf %43, %48 : vector<256x32xf32>
    %50 = vector.broadcast %24 : vector<1x32xf32> to vector<256x32xf32>
    %51 = arith.addf %49, %50 : vector<256x32xf32>
    %cst_32 = arith.constant 0.000000e+00 : f32
    %52 = vector.broadcast %cst_32 : f32 to vector<256x32xf32>
    %53 = arith.maximumf %51, %52 : vector<256x32xf32>
    %54 = arith.truncf %53 : vector<256x32xf32> to vector<256x32xbf16>
    %cst_33 = arith.constant 0.000000e+00 : f32
    %55 = vector.broadcast %cst_33 : f32 to vector<256x32xf32>
    %56 = vector.extract_strided_slice %18 {offsets = [0, 0, 0], sizes = [16, 16, 16], strides = [1, 1, 1]} : vector<18x16x16xbf16> to vector<16x16x16xbf16>
    %57 = vector.shape_cast %56 : vector<16x16x16xbf16> to vector<256x16xbf16>
    %c1_34 = arith.constant 1 : index
    %c0_35 = arith.constant 0 : index
    %c0_36 = arith.constant 0 : index
    %c0_37 = arith.constant 0 : index
    %58 = vector.load %arg5[%c1_34, %c0_35, %c0_36, %c0_37] : memref<4x4x16x32xbf16, #tpu.memory_space<vmem>>, vector<1x1x16x32xbf16>
    %59 = vector.shape_cast %58 : vector<1x1x16x32xbf16> to vector<16x32xbf16>
    %cst_38 = arith.constant dense<0.000000e+00> : vector<256x32xf32>
    %60 = tpu.matmul %57, %59, %cst_38 {dimension_numbers = #tpu.dot_dimension_numbers<[1], [0], [0], [1], [0, 0, 1, 1], [], []>} : vector<256x16xbf16>, vector<16x32xbf16>, vector<256x32xf32> -> vector<256x32xf32>
    %61 = arith.addf %55, %60 : vector<256x32xf32>
    %62 = vector.extract_strided_slice %23 {offsets = [0, 0, 0], sizes = [16, 16, 16], strides = [1, 1, 1]} : vector<18x16x16xbf16> to vector<16x16x16xbf16>
    %63 = vector.shape_cast %62 : vector<16x16x16xbf16> to vector<256x16xbf16>
    %c1_39 = arith.constant 1 : index
    %c1_40 = arith.constant 1 : index
    %c0_41 = arith.constant 0 : index
    %c0_42 = arith.constant 0 : index
    %64 = vector.load %arg5[%c1_39, %c1_40, %c0_41, %c0_42] : memref<4x4x16x32xbf16, #tpu.memory_space<vmem>>, vector<1x1x16x32xbf16>
    %65 = vector.shape_cast %64 : vector<1x1x16x32xbf16> to vector<16x32xbf16>
    %cst_43 = arith.constant dense<0.000000e+00> : vector<256x32xf32>
    %66 = tpu.matmul %63, %65, %cst_43 {dimension_numbers = #tpu.dot_dimension_numbers<[1], [0], [0], [1], [0, 0, 1, 1], [], []>} : vector<256x16xbf16>, vector<16x32xbf16>, vector<256x32xf32> -> vector<256x32xf32>
    %67 = arith.addf %61, %66 : vector<256x32xf32>
    %68 = vector.extract_strided_slice %18 {offsets = [1, 0, 0], sizes = [16, 16, 16], strides = [1, 1, 1]} : vector<18x16x16xbf16> to vector<16x16x16xbf16>
    %69 = vector.shape_cast %68 : vector<16x16x16xbf16> to vector<256x16xbf16>
    %c1_44 = arith.constant 1 : index
    %c2_45 = arith.constant 2 : index
    %c0_46 = arith.constant 0 : index
    %c0_47 = arith.constant 0 : index
    %70 = vector.load %arg5[%c1_44, %c2_45, %c0_46, %c0_47] : memref<4x4x16x32xbf16, #tpu.memory_space<vmem>>, vector<1x1x16x32xbf16>
    %71 = vector.shape_cast %70 : vector<1x1x16x32xbf16> to vector<16x32xbf16>
    %cst_48 = arith.constant dense<0.000000e+00> : vector<256x32xf32>
    %72 = tpu.matmul %69, %71, %cst_48 {dimension_numbers = #tpu.dot_dimension_numbers<[1], [0], [0], [1], [0, 0, 1, 1], [], []>} : vector<256x16xbf16>, vector<16x32xbf16>, vector<256x32xf32> -> vector<256x32xf32>
    %73 = arith.addf %67, %72 : vector<256x32xf32>
    %74 = vector.extract_strided_slice %23 {offsets = [1, 0, 0], sizes = [16, 16, 16], strides = [1, 1, 1]} : vector<18x16x16xbf16> to vector<16x16x16xbf16>
    %75 = vector.shape_cast %74 : vector<16x16x16xbf16> to vector<256x16xbf16>
    %c1_49 = arith.constant 1 : index
    %c3_50 = arith.constant 3 : index
    %c0_51 = arith.constant 0 : index
    %c0_52 = arith.constant 0 : index
    %76 = vector.load %arg5[%c1_49, %c3_50, %c0_51, %c0_52] : memref<4x4x16x32xbf16, #tpu.memory_space<vmem>>, vector<1x1x16x32xbf16>
    %77 = vector.shape_cast %76 : vector<1x1x16x32xbf16> to vector<16x32xbf16>
    %cst_53 = arith.constant dense<0.000000e+00> : vector<256x32xf32>
    %78 = tpu.matmul %75, %77, %cst_53 {dimension_numbers = #tpu.dot_dimension_numbers<[1], [0], [0], [1], [0, 0, 1, 1], [], []>} : vector<256x16xbf16>, vector<16x32xbf16>, vector<256x32xf32> -> vector<256x32xf32>
    %79 = arith.addf %73, %78 : vector<256x32xf32>
    %80 = vector.broadcast %24 : vector<1x32xf32> to vector<256x32xf32>
    %81 = arith.addf %79, %80 : vector<256x32xf32>
    %cst_54 = arith.constant 0.000000e+00 : f32
    %82 = vector.broadcast %cst_54 : f32 to vector<256x32xf32>
    %83 = arith.maximumf %81, %82 : vector<256x32xf32>
    %84 = arith.truncf %83 : vector<256x32xf32> to vector<256x32xbf16>
    %85 = tpu.concatenate %54, %84 in 1 : vector<256x32xbf16>, vector<256x32xbf16> -> vector<256x64xbf16>
    %86 = vector.shape_cast %85 : vector<256x64xbf16> to vector<16x16x64xbf16>
    %c0_55 = arith.constant 0 : index
    %c0_56 = arith.constant 0 : index
    %c0_57 = arith.constant 0 : index
    %c0_58 = arith.constant 0 : index
    %c0_59 = arith.constant 0 : index
    %c0_60 = arith.constant 0 : index
    %87 = vector.load %arg7[%c0_55, %c0_56, %c0_57, %c0_58, %c0_59, %c0_60] : memref<1x1x16x2x16x64xbf16, #tpu.memory_space<vmem>>, vector<1x1x16x1x16x64xbf16>
    %88 = vector.shape_cast %87 : vector<1x1x16x1x16x64xbf16> to vector<16x16x64xbf16>
    %89 = vector.shape_cast %86 : vector<16x16x64xbf16> to vector<1x1x16x1x16x64xbf16>
    tpu.vector_store %arg7[%c0_55, %c0_56, %c0_57, %c0_58, %c0_59, %c0_60], %89 {strides = array<i32>} : memref<1x1x16x2x16x64xbf16, #tpu.memory_space<vmem>>, vector<1x1x16x1x16x64xbf16>,
    %cst_61 = arith.constant 0.000000e+00 : f32
    %90 = vector.broadcast %cst_61 : f32 to vector<256x32xf32>
    %91 = vector.extract_strided_slice %21 {offsets = [1, 0, 0], sizes = [16, 16, 16], strides = [1, 1, 1]} : vector<18x16x16xbf16> to vector<16x16x16xbf16>
    %92 = vector.shape_cast %91 : vector<16x16x16xbf16> to vector<256x16xbf16>
    %c2_62 = arith.constant 2 : index
    %c0_63 = arith.constant 0 : index
    %c0_64 = arith.constant 0 : index
    %c0_65 = arith.constant 0 : index
    %93 = vector.load %arg5[%c2_62, %c0_63, %c0_64, %c0_65] : memref<4x4x16x32xbf16, #tpu.memory_space<vmem>>, vector<1x1x16x32xbf16>
    %94 = vector.shape_cast %93 : vector<1x1x16x32xbf16> to vector<16x32xbf16>
    %cst_66 = arith.constant dense<0.000000e+00> : vector<256x32xf32>
    %95 = tpu.matmul %92, %94, %cst_66 {dimension_numbers = #tpu.dot_dimension_numbers<[1], [0], [0], [1], [0, 0, 1, 1], [], []>} : vector<256x16xbf16>, vector<16x32xbf16>, vector<256x32xf32> -> vector<256x32xf32>
    %96 = arith.addf %90, %95 : vector<256x32xf32>
    %97 = vector.extract_strided_slice %18 {offsets = [1, 0, 0], sizes = [16, 16, 16], strides = [1, 1, 1]} : vector<18x16x16xbf16> to vector<16x16x16xbf16>
    %98 = vector.shape_cast %97 : vector<16x16x16xbf16> to vector<256x16xbf16>
    %c2_67 = arith.constant 2 : index
    %c1_68 = arith.constant 1 : index
    %c0_69 = arith.constant 0 : index
    %c0_70 = arith.constant 0 : index
    %99 = vector.load %arg5[%c2_67, %c1_68, %c0_69, %c0_70] : memref<4x4x16x32xbf16, #tpu.memory_space<vmem>>, vector<1x1x16x32xbf16>
    %100 = vector.shape_cast %99 : vector<1x1x16x32xbf16> to vector<16x32xbf16>
    %cst_71 = arith.constant dense<0.000000e+00> : vector<256x32xf32>
    %101 = tpu.matmul %98, %100, %cst_71 {dimension_numbers = #tpu.dot_dimension_numbers<[1], [0], [0], [1], [0, 0, 1, 1], [], []>} : vector<256x16xbf16>, vector<16x32xbf16>, vector<256x32xf32> -> vector<256x32xf32>
    %102 = arith.addf %96, %101 : vector<256x32xf32>
    %103 = vector.extract_strided_slice %21 {offsets = [2, 0, 0], sizes = [16, 16, 16], strides = [1, 1, 1]} : vector<18x16x16xbf16> to vector<16x16x16xbf16>
    %104 = vector.shape_cast %103 : vector<16x16x16xbf16> to vector<256x16xbf16>
    %c2_72 = arith.constant 2 : index
    %c2_73 = arith.constant 2 : index
    %c0_74 = arith.constant 0 : index
    %c0_75 = arith.constant 0 : index
    %105 = vector.load %arg5[%c2_72, %c2_73, %c0_74, %c0_75] : memref<4x4x16x32xbf16, #tpu.memory_space<vmem>>, vector<1x1x16x32xbf16>
    %106 = vector.shape_cast %105 : vector<1x1x16x32xbf16> to vector<16x32xbf16>
    %cst_76 = arith.constant dense<0.000000e+00> : vector<256x32xf32>
    %107 = tpu.matmul %104, %106, %cst_76 {dimension_numbers = #tpu.dot_dimension_numbers<[1], [0], [0], [1], [0, 0, 1, 1], [], []>} : vector<256x16xbf16>, vector<16x32xbf16>, vector<256x32xf32> -> vector<256x32xf32>
    %108 = arith.addf %102, %107 : vector<256x32xf32>
    %109 = vector.extract_strided_slice %18 {offsets = [2, 0, 0], sizes = [16, 16, 16], strides = [1, 1, 1]} : vector<18x16x16xbf16> to vector<16x16x16xbf16>
    %110 = vector.shape_cast %109 : vector<16x16x16xbf16> to vector<256x16xbf16>
    %c2_77 = arith.constant 2 : index
    %c3_78 = arith.constant 3 : index
    %c0_79 = arith.constant 0 : index
    %c0_80 = arith.constant 0 : index
    %111 = vector.load %arg5[%c2_77, %c3_78, %c0_79, %c0_80] : memref<4x4x16x32xbf16, #tpu.memory_space<vmem>>, vector<1x1x16x32xbf16>
    %112 = vector.shape_cast %111 : vector<1x1x16x32xbf16> to vector<16x32xbf16>
    %cst_81 = arith.constant dense<0.000000e+00> : vector<256x32xf32>
    %113 = tpu.matmul %110, %112, %cst_81 {dimension_numbers = #tpu.dot_dimension_numbers<[1], [0], [0], [1], [0, 0, 1, 1], [], []>} : vector<256x16xbf16>, vector<16x32xbf16>, vector<256x32xf32> -> vector<256x32xf32>
    %114 = arith.addf %108, %113 : vector<256x32xf32>
    %115 = vector.broadcast %24 : vector<1x32xf32> to vector<256x32xf32>
    %116 = arith.addf %114, %115 : vector<256x32xf32>
    %cst_82 = arith.constant 0.000000e+00 : f32
    %117 = vector.broadcast %cst_82 : f32 to vector<256x32xf32>
    %118 = arith.maximumf %116, %117 : vector<256x32xf32>
    %119 = arith.truncf %118 : vector<256x32xf32> to vector<256x32xbf16>
    %cst_83 = arith.constant 0.000000e+00 : f32
    %120 = vector.broadcast %cst_83 : f32 to vector<256x32xf32>
    %121 = vector.extract_strided_slice %18 {offsets = [1, 0, 0], sizes = [16, 16, 16], strides = [1, 1, 1]} : vector<18x16x16xbf16> to vector<16x16x16xbf16>
    %122 = vector.shape_cast %121 : vector<16x16x16xbf16> to vector<256x16xbf16>
    %c3_84 = arith.constant 3 : index
    %c0_85 = arith.constant 0 : index
    %c0_86 = arith.constant 0 : index
    %c0_87 = arith.constant 0 : index
    %123 = vector.load %arg5[%c3_84, %c0_85, %c0_86, %c0_87] : memref<4x4x16x32xbf16, #tpu.memory_space<vmem>>, vector<1x1x16x32xbf16>
    %124 = vector.shape_cast %123 : vector<1x1x16x32xbf16> to vector<16x32xbf16>
    %cst_88 = arith.constant dense<0.000000e+00> : vector<256x32xf32>
    %125 = tpu.matmul %122, %124, %cst_88 {dimension_numbers = #tpu.dot_dimension_numbers<[1], [0], [0], [1], [0, 0, 1, 1], [], []>} : vector<256x16xbf16>, vector<16x32xbf16>, vector<256x32xf32> -> vector<256x32xf32>
    %126 = arith.addf %120, %125 : vector<256x32xf32>
    %127 = vector.extract_strided_slice %23 {offsets = [1, 0, 0], sizes = [16, 16, 16], strides = [1, 1, 1]} : vector<18x16x16xbf16> to vector<16x16x16xbf16>
    %128 = vector.shape_cast %127 : vector<16x16x16xbf16> to vector<256x16xbf16>
    %c3_89 = arith.constant 3 : index
    %c1_90 = arith.constant 1 : index
    %c0_91 = arith.constant 0 : index
    %c0_92 = arith.constant 0 : index
    %129 = vector.load %arg5[%c3_89, %c1_90, %c0_91, %c0_92] : memref<4x4x16x32xbf16, #tpu.memory_space<vmem>>, vector<1x1x16x32xbf16>
    %130 = vector.shape_cast %129 : vector<1x1x16x32xbf16> to vector<16x32xbf16>
    %cst_93 = arith.constant dense<0.000000e+00> : vector<256x32xf32>
    %131 = tpu.matmul %128, %130, %cst_93 {dimension_numbers = #tpu.dot_dimension_numbers<[1], [0], [0], [1], [0, 0, 1, 1], [], []>} : vector<256x16xbf16>, vector<16x32xbf16>, vector<256x32xf32> -> vector<256x32xf32>
    %132 = arith.addf %126, %131 : vector<256x32xf32>
    %133 = vector.extract_strided_slice %18 {offsets = [2, 0, 0], sizes = [16, 16, 16], strides = [1, 1, 1]} : vector<18x16x16xbf16> to vector<16x16x16xbf16>
    %134 = vector.shape_cast %133 : vector<16x16x16xbf16> to vector<256x16xbf16>
    %c3_94 = arith.constant 3 : index
    %c2_95 = arith.constant 2 : index
    %c0_96 = arith.constant 0 : index
    %c0_97 = arith.constant 0 : index
    %135 = vector.load %arg5[%c3_94, %c2_95, %c0_96, %c0_97] : memref<4x4x16x32xbf16, #tpu.memory_space<vmem>>, vector<1x1x16x32xbf16>
    %136 = vector.shape_cast %135 : vector<1x1x16x32xbf16> to vector<16x32xbf16>
    %cst_98 = arith.constant dense<0.000000e+00> : vector<256x32xf32>
    %137 = tpu.matmul %134, %136, %cst_98 {dimension_numbers = #tpu.dot_dimension_numbers<[1], [0], [0], [1], [0, 0, 1, 1], [], []>} : vector<256x16xbf16>, vector<16x32xbf16>, vector<256x32xf32> -> vector<256x32xf32>
    %138 = arith.addf %132, %137 : vector<256x32xf32>
    %139 = vector.extract_strided_slice %23 {offsets = [2, 0, 0], sizes = [16, 16, 16], strides = [1, 1, 1]} : vector<18x16x16xbf16> to vector<16x16x16xbf16>
    %140 = vector.shape_cast %139 : vector<16x16x16xbf16> to vector<256x16xbf16>
    %c3_99 = arith.constant 3 : index
    %c3_100 = arith.constant 3 : index
    %c0_101 = arith.constant 0 : index
    %c0_102 = arith.constant 0 : index
    %141 = vector.load %arg5[%c3_99, %c3_100, %c0_101, %c0_102] : memref<4x4x16x32xbf16, #tpu.memory_space<vmem>>, vector<1x1x16x32xbf16>
    %142 = vector.shape_cast %141 : vector<1x1x16x32xbf16> to vector<16x32xbf16>
    %cst_103 = arith.constant dense<0.000000e+00> : vector<256x32xf32>
    %143 = tpu.matmul %140, %142, %cst_103 {dimension_numbers = #tpu.dot_dimension_numbers<[1], [0], [0], [1], [0, 0, 1, 1], [], []>} : vector<256x16xbf16>, vector<16x32xbf16>, vector<256x32xf32> -> vector<256x32xf32>
    %144 = arith.addf %138, %143 : vector<256x32xf32>
    %145 = vector.broadcast %24 : vector<1x32xf32> to vector<256x32xf32>
    %146 = arith.addf %144, %145 : vector<256x32xf32>
    %cst_104 = arith.constant 0.000000e+00 : f32
    %147 = vector.broadcast %cst_104 : f32 to vector<256x32xf32>
    %148 = arith.maximumf %146, %147 : vector<256x32xf32>
    %149 = arith.truncf %148 : vector<256x32xf32> to vector<256x32xbf16>
    %150 = tpu.concatenate %119, %149 in 1 : vector<256x32xbf16>, vector<256x32xbf16> -> vector<256x64xbf16>
    %151 = vector.shape_cast %150 : vector<256x64xbf16> to vector<16x16x64xbf16>
    %c0_105 = arith.constant 0 : index
    %c0_106 = arith.constant 0 : index
    %c0_107 = arith.constant 0 : index
    %c1_108 = arith.constant 1 : index
    %c0_109 = arith.constant 0 : index
    %c0_110 = arith.constant 0 : index
    %152 = vector.load %arg7[%c0_105, %c0_106, %c0_107, %c1_108, %c0_109, %c0_110] : memref<1x1x16x2x16x64xbf16, #tpu.memory_space<vmem>>, vector<1x1x16x1x16x64xbf16>
    %153 = vector.shape_cast %152 : vector<1x1x16x1x16x64xbf16> to vector<16x16x64xbf16>
    %154 = vector.shape_cast %151 : vector<16x16x64xbf16> to vector<1x1x16x1x16x64xbf16>
    tpu.vector_store %arg7[%c0_105, %c0_106, %c0_107, %c1_108, %c0_109, %c0_110], %154 {strides = array<i32>} : memref<1x1x16x2x16x64xbf16, #tpu.memory_space<vmem>>, vector<1x1x16x1x16x64xbf16>,
    return
  }
  func.func @transform_0(%arg0: i32, %arg1: i32) -> (i32, i32, i32, i32) {
    %c0_i32 = arith.constant 0 : i32
    %c0_i32_0 = arith.constant 0 : i32
    %c0_i32_1 = arith.constant 0 : i32
    return %arg0, %arg1, %c0_i32, %c0_i32_0 : i32, i32, i32, i32
  }
  func.func @transform_1(%arg0: i32, %arg1: i32) -> (i32, i32, i32, i32) {
    %c16_i32 = arith.constant 16 : i32
    %0 = arith.muli %arg1, %c16_i32 : i32
    %c1_i32 = arith.constant 1 : i32
    %1 = arith.subi %0, %c1_i32 : i32
    %c0_i32 = arith.constant 0 : i32
    %2 = arith.maxsi %1, %c0_i32 : i32
    %c0_i32_0 = arith.constant 0 : i32
    %c0_i32_1 = arith.constant 0 : i32
    %c0_i32_2 = arith.constant 0 : i32
    return %arg0, %2, %c0_i32_0, %c0_i32_1 : i32, i32, i32, i32
  }
  func.func @transform_2(%arg0: i32, %arg1: i32) -> (i32, i32, i32, i32) {
    %c16_i32 = arith.constant 16 : i32
    %0 = arith.muli %arg1, %c16_i32 : i32
    %c16_i32_0 = arith.constant 16 : i32
    %1 = arith.addi %0, %c16_i32_0 : i32
    %c15_i32 = arith.constant 15 : i32
    %2 = arith.minsi %1, %c15_i32 : i32
    %c0_i32 = arith.constant 0 : i32
    %c0_i32_1 = arith.constant 0 : i32
    %c0_i32_2 = arith.constant 0 : i32
    return %arg0, %2, %c0_i32, %c0_i32_1 : i32, i32, i32, i32
  }
  func.func @transform_3(%arg0: i32, %arg1: i32) -> (i32, i32, i32, i32) {
    %c0_i32 = arith.constant 0 : i32
    %c0_i32_0 = arith.constant 0 : i32
    %c0_i32_1 = arith.constant 0 : i32
    %c0_i32_2 = arith.constant 0 : i32
    %c0_i32_3 = arith.constant 0 : i32
    return %c0_i32, %c0_i32_0, %c0_i32_1, %c0_i32_2 : i32, i32, i32, i32
  }
  func.func @transform_4(%arg0: i32, %arg1: i32) -> (i32, i32) {
    %c0_i32 = arith.constant 0 : i32
    %c0_i32_0 = arith.constant 0 : i32
    %c0_i32_1 = arith.constant 0 : i32
    return %c0_i32, %c0_i32_0 : i32, i32
  }
  func.func @transform_5(%arg0: i32, %arg1: i32) -> (i32, i32, i32, i32, i32, i32) {
    %c0_i32 = arith.constant 0 : i32
    %c0_i32_0 = arith.constant 0 : i32
    %c0_i32_1 = arith.constant 0 : i32
    %c0_i32_2 = arith.constant 0 : i32
    %c0_i32_3 = arith.constant 0 : i32
    return %arg0, %arg1, %c0_i32, %c0_i32_0, %c0_i32_1, %c0_i32_2 : i32, i32, i32, i32, i32, i32
  }
}

</mosaic_0001>

<bundles_post_ra>
// kernel: up_conv_forward.1
= control target key start
LH: loop header
LB: loop body
LE: loop exit
PB: predicated region body
PF: predicated region fallthrough
CT: control target
= control target key end

     0   :  { %s6624_s18 = smov 0   ;;  %s6626_s19 = smov 0   ;;  %s8043_s0 = inlined_call_operand.vmem [shape: bf16[2,16,16,16], index: 0, kind: input, shape index: {}, may-alias: {0,1,2}]   ;;  %s8044_s1 = inlined_call_operand.vmem [shape: bf16[2,16,16,16], index: 1, kind: input, shape index: {}, may-alias: {0,1,2}]   ;;  %s8045_s2 = inlined_call_operand.vmem [shape: bf16[2,16,16,16], index: 2, kind: input, shape index: {}, may-alias: {0,1,2}]   ;;  %s8046_s3 = inlined_call_operand.vmem [shape: bf16[4,4,16,32], index: 3, kind: input, shape index: {}]   ;;  %s8047_s4 = inlined_call_operand.vmem [shape: f32[1,32], index: 4, kind: input, shape index: {}]   ;;  %s8048_s5 = inlined_call_operand.vmem [shape: bf16[2,1,16,2,16,64], index: 5, kind: output, shape index: {}]  }
   0x1   :  { %s6628_s20 = smov 0  }
   0x2 LB: > { %s27_s21 = sadd.s32 1, %s6587_s19  ;;  %p4863_p0 = scmp.ge.s32.totalorder %s6591_s20, 1  ;;  %s6591_s20 = sphi %s6628_s20, %s15_s20   ;;  %s6587_s19 = sphi %s6626_s19, %s8070_s19   ;;  %s6583_s18 = sphi %s6624_s18, %s8069_s18  }
   0x3   : > { %p29_p1 = scmp.ge.s32.totalorder %s27_s21, 2  ;;  %p273_p2 = scmp.lt.s32.totalorder %s6591_s20, 3 }
   0x5   : > { %s8072_s21 = smov (%p29_p1, %s27_s21), 0  ;;  %p274_p3 = pnand %p4863_p0, %p273_p2 }
   0x6   : > { %v6522_v0 = vld [vmem:[%s8046_s3 + $0x8] sm:$0xff] (!%p274_p3)   ;;  %p337_p4 = scmp.lt.s32.totalorder (!%p274_p3), %s6583_s18, 1  ;;  %v6525_v2 = vld [vmem:[%s8046_s3 + $0x20] sm:$0xff] (!%p274_p3)   ;;  %vm807_vm0 = vcmask (!%p274_p3), 130048   ;;  %vm774_vm1 = vcmask (!%p274_p3), 1047552   ;;  %v6788_v53 = vld [vmem:[%s8046_s3 + $0x30] sm:$0xff] (!%p274_p3)  }
   0x7   : > { %277 = sbr.rel (%p274_p3) target bundleno = 874 (0x36a), region = 40  ;;  %v6524_v1 = vld [vmem:[%s8046_s3 + $0x28] sm:$0xff] (!%p274_p3)   ;;  %5569 = vmatprep.subr.bf16.mxu0 (!%p274_p3), %v6522_v0  ;;  %v6540_v3 = vld [vmem:[%s8046_s3] sm:$0xff] (!%p274_p3)   ;;  %vm775_vm2 = vsmask.f32 (!%p274_p3), 7424  ;;  %v6804_v58 = vld [vmem:[%s8046_s3 + $0x10] sm:$0xff] (!%p274_p3)  }
   0x8   : > { %5570 = vmatpush3.bf16.msra.mxu0 (!%p274_p3), %v6522_v0  ;;  %5705 = vmatprep.subr.bf16.mxu1 (!%p274_p3), %v6524_v1  ;;  %vm6698_vm3 = vmand (!%p274_p3), %vm774_vm1, %vm775_vm2  ;;  %vm699_vm4 = vcmask (!%p274_p3), 1040384   ;;  %vm700_vm5 = vsmask.f32 (!%p274_p3), 256  ;;  %s6593_s26 = smov (!%p274_p3), 32   ;;  %vm2634_vm7 = vcmask (!%p274_p3), 261120   ;;  %vm2795_vm8 = vcmask (!%p274_p3), 519168  }
   0x9   : > { %5706 = vmatpush3.bf16.msra.mxu1 (!%p274_p3), %v6524_v1  ;;  %5603 = vmatprep.subr.bf16.mxu0 (!%p274_p3), %v6540_v3  ;;  %vm6933_vm6 = vmand (!%p274_p3), %vm699_vm4, %vm700_vm5 }
   0xa   : > { %5739 = vmatprep.subr.bf16.mxu1 (!%p274_p3), %v6525_v2 }
   0xe   : > { %s8074_s18 = smov (!%p337_p4, %s6583_s18), 1 }
   0xf   : > { %s6654_s28 = sshll.u32 %s8074_s18, 7 }
  0x10   : > { %s6660_s6 = scalar_lea.vmem %s8043_s0, %s6654_s28  ;;  %s359_s9 = scalar_lea.vmem %s8044_s1, %s6654_s28 }
  0x11   : > { %v423_v4 = vld [vmem:[%s359_s9] sm:$0xf]  ;;  %v424_v5 = vld [vmem:[%s359_s9 + $0x4] sm:$0xf]  ;;  %v6675_v10 = vld [vmem:[%s6660_s6 + $0x8] sm:$0xff]   ;;  %s5294_s23 = sadd.s32 120, %s6654_s28 }
  0x12   : > { %v6670_v6 = vld [vmem:[%s6660_s6] sm:$0xff]   ;;  %v442_v7 = vmul.bf16 0.0, %v423_v4  ;;  %v443_v8 = vmul.bf16 0.0, %v424_v5  ;;  %v6680_v13 = vld [vmem:[%s6660_s6 + $0x10] sm:$0xff]   ;;  %v570_v17 = vshrl.u32 %v6675_v10, 16  ;;  %v573_v18 = vshll.u32 %v6675_v10, 16  ;;  %s376_s28 = scalar_lea.vmem %s8045_s2, %s5294_s23 }
  0x13   : > { %v563_v11 = vshrl.u32 %v6670_v6, 16  ;;  %v566_v12 = vshll.u32 %v6670_v6, 16  ;;  %v6693_v19 = vld [vmem:[%s6660_s6 + $0x18] sm:$0xff]   ;;  %v580_v22 = vshll.u32 %v6680_v13, 16  ;;  %v577_v29 = vshrl.u32 %v6680_v13, 16  ;;  %v6722_v31 = vld [vmem:[%s6660_s6 + $0x20] sm:$0xff]  }
  0x14   : > { %v6672_v9 = vcombine.low %v442_v7, %v443_v8  ;;  %v724_v24 = vrot.slane %v573_v18, 1  ;;  %v587_v25 = vshll.u32 %v6693_v19, 16  ;;  %v584_v33 = vshrl.u32 %v6693_v19, 16  ;;  %v6730_v35 = vld [vmem:[%s6660_s6 + $0x28] sm:$0xff]   ;;  %v6753_v42 = vld [vmem:[%s6660_s6 + $0x30] sm:$0xff]   ;;  %v6769_v48 = vld [vmem:[%s6660_s6 + $0x38] sm:$0xff]  }
  0x15   : > { %v722_v16 = vrot.slane %v566_v12, 1  ;;  %v726_v30 = vrot.slane %v580_v22, 1  ;;  %v594_v38 = vshll.u32 %v6722_v31, 16  ;;  %v601_v40 = vshll.u32 %v6730_v35, 16  ;;  %v6791_v54 = vld [vmem:[%s6660_s6 + $0x40] sm:$0xff]   ;;  %v6814_v62 = vld [vmem:[%s6660_s6 + $0x48] sm:$0xff]  }
  0x16   : > { %5571 = vmatprep.mubr.msk.bf16.mxu0 %vm807_vm0, %v6672_v9  ;;  %v556_v14 = vshrl.u32 %v6672_v9, 16  ;;  %v559_v15 = vshll.u32 %v6672_v9, 16  ;;  %v725_v28 = vor.u32 %v724_v24, %v570_v17  ;;  %v728_v34 = vrot.slane %v587_v25, 1  ;;  %v6835_v5 = vld [vmem:[%s6660_s6 + $0x50] sm:$0xff]  }
  0x17   : > { %5572 = vmatmul.mubr.msk.bf16.vlgmr.msra.gmra.mrb[0].mxu0 %vm807_vm0, %v6670_v6  ;;  %v723_v23 = vor.u32 %v722_v16, %v563_v11  ;;  %v727_v37 = vor.u32 %v726_v30, %v577_v29  ;;  %v591_v41 = vshrl.u32 %v6722_v31, 16  ;;  %v730_v44 = vrot.slane %v594_v38, 1  ;;  %v6843_v16 = vld [vmem:[%s6660_s6 + $0x58] sm:$0xff]  }
  0x18   : > { %v720_v20 = vrot.slane %v559_v15, 1  ;;  %5575 = vmatprep.mubr.msk.bf16.mxu0 %vm807_vm0, %v6675_v10  ;;  %5604 = vmatpush3.bf16.msra.mxu0 %v6540_v3  ;;  %v6735_v36 = vsel %vm6698_vm3, %v725_v28, 0  ;;  %v729_v39 = vor.u32 %v728_v34, %v584_v33  ;;  %v598_v46 = vshrl.u32 %v6730_v35, 16 }
  0x19   : > { %v6714_v27 = vsel %vm6698_vm3, %v723_v23, 0  ;;  %v6757_v43 = vsel %vm6698_vm3, %v727_v37, 0  ;;  %v732_v47 = vrot.slane %v601_v40, 1  ;;  %v731_v49 = vor.u32 %v730_v44, %v591_v41  ;;  %5637 = vmatprep.subr.bf16.mxu0 %v6804_v58 }
  0x1a   : > { %v721_v26 = vor.u32 %v720_v20, %v556_v14  ;;  %v6763_v45 = vsel %vm6698_vm3, %v729_v39, 0  ;;  %v608_v50 = vshll.u32 %v6753_v42, 16  ;;  %v615_v52 = vshll.u32 %v6769_v48, 16  ;;  %v6873_v39 = vld [vmem:[%s6660_s6 + $0x60] sm:$0xff]  }
  0x1b   : > { %v733_v51 = vor.u32 %v732_v47, %v598_v46  ;;  %v6795_v55 = vsel %vm6698_vm3, %v731_v49, 0  ;;  %v605_v56 = vshrl.u32 %v6753_v42, 16  ;;  %v612_v60 = vshrl.u32 %v6769_v48, 16 }
  0x1c   : > { %v777_v32 = vsel %vm6698_vm3, %v721_v26, 0  ;;  %v734_v57 = vrot.slane %v608_v50, 1  ;;  %v736_v61 = vrot.slane %v615_v52, 1  ;;  %v622_v63 = vshll.u32 %v6791_v54, 16 }
  0x1d   : > { %5707 = vmatprep.mubr.msk.bf16.mxu1 %vm807_vm0, %v777_v32  ;;  %v6808_v59 = vsel %vm6698_vm3, %v733_v51, 0  ;;  %v619_v3 = vshrl.u32 %v6791_v54, 16  ;;  %v626_v7 = vshrl.u32 %v6814_v62, 16  ;;  %v8052_v26 = vshll.u32 %v6835_v5, 16  ;;  %v6883_v51 = vld [vmem:[%s6660_s6 + $0x68] sm:$0xff]  }
  0x1e   : > { %5708 = vmatmul.mubr.msk.bf16.vlgmr.msra.gmra.mrb[0].mxu1 %vm807_vm0, %v6714_v27  ;;  %v735_v0 = vor.u32 %v734_v57, %v605_v56  ;;  %v737_v1 = vor.u32 %v736_v61, %v612_v60  ;;  %v738_v4 = vrot.slane %v622_v63, 1  ;;  %v8049_v28 = vshll.u32 %v6843_v16, 16 }
  0x1f   : > { %5740 = vmatpush3.bf16.msra.mxu1 %v6525_v2  ;;  %5576 = vmatmul.mubr.msk.bf16.gmra.mrb[4].mxu0 %vm807_vm0, %v6680_v13  ;;  %v629_v2 = vshll.u32 %v6814_v62, 16  ;;  %v8055_v34 = vshrl.u32 %v6835_v5, 16  ;;  %v742_v37 = vrot.slane %v8052_v26, 1  ;;  %v8054_v47 = vshrl.u32 %v6843_v16, 16 }
  0x20   : > { %5711 = vmatprep.mubr.msk.bf16.mxu1 %vm807_vm0, %v6735_v36  ;;  %5579 = vmatprep.mubr.msk.bf16.mxu0 %vm807_vm0, %v6693_v19  ;;  %v6840_v8 = vsel %vm6698_vm3, %v735_v0, 0  ;;  %v6847_v20 = vsel %vm6698_vm3, %v737_v1, 0  ;;  %v739_v24 = vor.u32 %v738_v4, %v619_v3  ;;  %v744_v49 = vrot.slane %v8049_v28, 1 }
  0x21   : > { %5773 = vmatprep.subr.bf16.mxu1 %v6788_v53  ;;  %v740_v23 = vrot.slane %v629_v2, 1  ;;  %v743_v57 = vor.u32 %v742_v37, %v8055_v34  ;;  %v8050_v61 = vshll.u32 %v6873_v39, 16  ;;  %v8051_v1 = vshll.u32 %v6883_v51, 16 }
  0x22   : > { %v6867_v32 = vsel %vm6698_vm3, %v739_v24, 0  ;;  %v745_v0 = vor.u32 %v744_v49, %v8054_v47  ;;  %v654_v28 = vshrl.u32 %v6883_v51, 16  ;;  %v565_v34 = vrot.slane %v563_v11, 7 }
  0x23   : > { %v741_v30 = vor.u32 %v740_v23, %v626_v7  ;;  %v6901_v4 = vsel %vm6698_vm3, %v743_v57, 0  ;;  %v8053_v23 = vshrl.u32 %v6873_v39, 16  ;;  %v746_v24 = vrot.slane %v8050_v61, 1 }
  0x24   : > { %v6911_v37 = vsel %vm6698_vm3, %v745_v0, 0  ;;  %v748_v49 = vrot.slane %v8051_v1, 1  ;;  %v558_v57 = vrot.slane %v556_v14, 7 }
  0x25   : > { %v6877_v44 = vsel %vm6698_vm3, %v741_v30, 0  ;;  %v6907_v30 = vld [vmem:[%s6660_s6 + $0x70] sm:$0xff]   ;;  %v747_v0 = vor.u32 %v746_v24, %v8053_v23 }
  0x26   : > { %5712 = vmatmul.mubr.msk.bf16.gmra.mrb[4].mxu1 %vm807_vm0, %v6757_v43  ;;  %v8056_v61 = vshll.u32 %v6907_v30, 16  ;;  %v749_v14 = vor.u32 %v748_v49, %v654_v28  ;;  %v561_v1 = vor.u32 %v559_v15, %v558_v57  ;;  %v661_v23 = vshrl.u32 %v6907_v30, 16 }
  0x27   : > { %5580 = vmatmul.mubr.msk.bf16.gmra.mrb[8].mxu0 %vm807_vm0, %v6722_v31  ;;  %5715 = vmatprep.mubr.msk.bf16.mxu1 %vm807_vm0, %v6763_v45  ;;  %v6939_v24 = vsel %vm6698_vm3, %v747_v0, 0  ;;  %v572_v57 = vrot.slane %v570_v17, 7 }
  0x28   : > { %5583 = vmatprep.mubr.msk.bf16.mxu0 %vm807_vm0, %v6730_v35  ;;  %v750_v47 = vrot.slane %v8056_v61, 1  ;;  %v6948_v49 = vsel %vm6698_vm3, %v749_v14, 0  ;;  %v702_v15 = vsel %vm6933_vm6, 0, %v561_v1  ;;  %v568_v1 = vor.u32 %v566_v12, %v565_v34 }
  0x29   : > { %v575_v17 = vor.u32 %v573_v18, %v572_v57  ;;  %v579_v61 = vrot.slane %v577_v29, 7  ;;  %v586_v12 = vrot.slane %v584_v33, 7  ;;  %v6986_v18 = vld [vmem:[%s8046_s3 + $0x18] sm:$0xff]   ;;  %v614_v57 = vrot.slane %v612_v60, 7 }
  0x2a   : > { %v751_v11 = vor.u32 %v750_v47, %v661_v23  ;;  %v6973_v14 = vsel %vm6933_vm6, 0, %v568_v1  ;;  %v621_v60 = vrot.slane %v619_v3, 7  ;;  %v628_v1 = vrot.slane %v626_v7, 7 }
  0x2b   : > { %v6979_v47 = vsel %vm6933_vm6, 0, %v575_v17  ;;  %v582_v29 = vor.u32 %v580_v22, %v579_v61  ;;  %v589_v33 = vor.u32 %v587_v25, %v586_v12  ;;  %v600_v22 = vrot.slane %v598_v46, 7  ;;  %v7017_v25 = vld [vmem:[%s8046_s3 + $0x38] sm:$0xff]  }
  0x2c   : > { %v6969_v0 = vsel %vm6698_vm3, %v751_v11, 0  ;;  %v8061_v7 = vshrl.u32 %v6835_v5, 16 }
  0x2d   : > { %v7004_v34 = vsel %vm6933_vm6, 0, %v582_v29  ;;  %v603_v46 = vor.u32 %v601_v40, %v600_v22  ;;  %v617_v40 = vor.u32 %v615_v52, %v614_v57  ;;  %v631_v52 = vor.u32 %v629_v2, %v628_v1 }
  0x2e   : > { %5716 = vmatmul.mubr.msk.bf16.gmra.mrb[8].mxu1 %vm807_vm0, %v6795_v55  ;;  %v635_v17 = vrot.slane %v8061_v7, 7  ;;  %v8062_v29 = vshrl.u32 %v6843_v16, 16  ;;  %v8067_v1 = vshll.u32 %v6883_v51, 16 }
  0x2f   : > { %5584 = vmatmul.mubr.msk.bf16.gmra.mrb[12].mxu0 %vm807_vm0, %v6753_v42  ;;  %5719 = vmatprep.mubr.msk.bf16.mxu1 %vm807_vm0, %v6808_v59  ;;  %v7041_v61 = vsel %vm6933_vm6, 0, %v603_v46  ;;  %v7065_v11 = vsel %vm6933_vm6, 0, %v617_v40  ;;  %v7089_v12 = vsel %vm6933_vm6, 0, %v631_v52  ;;  %v8065_v46 = vshrl.u32 %v6873_v39, 16 }
  0x30   : > { %5587 = vmatprep.mubr.msk.bf16.mxu0 %vm807_vm0, %v6769_v48  ;;  %v8066_v40 = vshll.u32 %v6873_v39, 16  ;;  %v663_v52 = vrot.slane %v661_v23, 7 }
  0x36   : > { %5720 = vmatmul.mubr.msk.bf16.gmra.mrb[12].mxu1 %vm807_vm0, %v6840_v8 }
  0x37   : > { %5588 = vmatmul.mubr.msk.bf16.gmra.mrb[16].mxu0 %vm807_vm0, %v6791_v54  ;;  %5723 = vmatprep.mubr.msk.bf16.mxu1 %vm807_vm0, %v6847_v20 }
  0x38   : > { %5591 = vmatprep.mubr.msk.bf16.mxu0 %vm807_vm0, %v6814_v62 }
  0x3e   : > { %5724 = vmatmul.mubr.msk.bf16.gmra.mrb[16].mxu1 %vm807_vm0, %v6867_v32 }
  0x3f   : > { %5592 = vmatmul.mubr.msk.bf16.gmra.mrb[20].mxu0 %vm807_vm0, %v6835_v5  ;;  %5727 = vmatprep.mubr.msk.bf16.mxu1 %vm807_vm0, %v6877_v44 }
  0x40   : > { %5595 = vmatprep.mubr.msk.bf16.mxu0 %vm807_vm0, %v6843_v16 }
  0x46   : > { %5728 = vmatmul.mubr.msk.bf16.gmra.mrb[20].mxu1 %vm807_vm0, %v6901_v4 }
  0x47   : > { %5596 = vmatmul.mubr.msk.bf16.gmra.mrb[24].mxu0 %vm807_vm0, %v6873_v39  ;;  %5731 = vmatprep.mubr.msk.bf16.mxu1 %vm807_vm0, %v6911_v37 }
  0x48   : > { %5599 = vmatprep.mubr.msk.bf16.mxu0 %vm807_vm0, %v6883_v51 }
  0x4e   : > { %5732 = vmatmul.mubr.msk.bf16.gmra.mrb[24].mxu1 %vm807_vm0, %v6939_v24 }
  0x4f   : > { %5600 = vmatmul.mubr.msk.bf16.gmra.mrb[28].mxu0 %vm807_vm0, %v6907_v30  ;;  %5735 = vmatprep.mubr.msk.bf16.mxu1 %vm807_vm0, %v6948_v49 }
  0x50   : > { %5605 = vmatprep.mubr.msk.bf16.mxu0 %vm807_vm0, %v702_v15  ;;  %v7010_v15 = vsel %vm6933_vm6, 0, %v589_v33  ;;  %v642_v33 = vrot.slane %v8062_v29, 7 }
  0x56   : > { %5736 = vmatmul.mubr.msk.bf16.gmra.mrb[28].mxu1 %vm807_vm0, %v6969_v0 }
  0x57   : > { %5606 = vmatmul.mubr.msk.bf16.vlgmr.msra.gmra.mrb[0].mxu0 %vm807_vm0, %v6973_v14  ;;  %5741 = vmatprep.mubr.msk.bf16.mxu1 %vm807_vm0, %v6672_v9  ;;  %v593_v9 = vrot.slane %v591_v41, 7 }
  0x58   : > { %5609 = vmatprep.mubr.msk.bf16.mxu0 %vm807_vm0, %v6979_v47  ;;  %5638 = vmatpush3.bf16.msra.mxu0 %v6804_v58  ;;  %v607_v58 = vrot.slane %v605_v56, 7 }
  0x59   : > { %5671 = vmatprep.subr.bf16.mxu0 %v6986_v18  ;;  %v596_v41 = vor.u32 %v594_v38, %v593_v9  ;;  %v8064_v9 = vshll.u32 %v6843_v16, 16 }
  0x5a   : > { %v610_v38 = vor.u32 %v608_v50, %v607_v58  ;;  %v624_v50 = vor.u32 %v622_v63, %v621_v60  ;;  %v8063_v63 = vshll.u32 %v6835_v5, 16  ;;  %v649_v58 = vrot.slane %v8065_v46, 7 }
  0x5b   : > { %v645_v22 = vor.u32 %v8064_v9, %v642_v33  ;;  %v6547_v33 = vld [vmem:[%s8046_s3 + $0x48] sm:$0xff]  }
  0x5c   : > { %v7059_v56 = vsel %vm6933_vm6, 0, %v610_v38  ;;  %v7083_v3 = vsel %vm6933_vm6, 0, %v624_v50  ;;  %v638_v2 = vor.u32 %v8063_v63, %v635_v17  ;;  %v656_v38 = vrot.slane %v654_v28, 7  ;;  %v6546_v63 = vld [vmem:[%s8046_s3 + $0x68] sm:$0xff]  }
  0x5d   : > { %v7113_v57 = vsel %vm6933_vm6, 0, %v645_v22  ;;  %v652_v60 = vor.u32 %v8066_v40, %v649_v58  ;;  %v8068_v17 = vshll.u32 %v6907_v30, 16  ;;  %v6549_v58 = vld [vmem:[%s8046_s3 + $0x40] sm:$0xff]  }
  0x5e   : > { %5742 = vmatmul.mubr.msk.bf16.vlgmr.msra.gmra.mrb[0].mxu1 %vm807_vm0, %v6670_v6  ;;  %v659_v50 = vor.u32 %v8067_v1, %v656_v38  ;;  %v6548_v38 = vld [vmem:[%s8046_s3 + $0x60] sm:$0xff]  }
  0x5f   : > { %5774 = vmatpush3.bf16.msra.mxu1 %v6788_v53  ;;  %5610 = vmatmul.mubr.msk.bf16.gmra.mrb[4].mxu0 %vm807_vm0, %v7004_v34  ;;  %v7035_v53 = vsel %vm6933_vm6, 0, %v596_v41  ;;  %v7107_v41 = vsel %vm6933_vm6, 0, %v638_v2  ;;  %v7131_v28 = vsel %vm6933_vm6, 0, %v652_v60  ;;  %v666_v29 = vor.u32 %v8068_v17, %v663_v52  ;;  %v6550_v52 = vld [vmem:[%s8046_s3 + $0x70] sm:$0xff]  }
  0x60   : > { %5745 = vmatprep.mubr.msk.bf16.mxu1 %vm807_vm0, %v6675_v10  ;;  %5613 = vmatprep.mubr.msk.bf16.mxu0 %vm807_vm0, %v7010_v15  ;;  %v7137_v7 = vsel %vm6933_vm6, 0, %v659_v50  ;;  %v6551_v50 = vld [vmem:[%s8046_s3 + $0x50] sm:$0xff]  }
  0x61   : > { %5807 = vmatprep.subr.bf16.mxu1 %v7017_v25  ;;  %v7151_v23 = vsel %vm6933_vm6, 0, %v666_v29 }
  0x66   : > { %5746 = vmatmul.mubr.msk.bf16.gmra.mrb[4].mxu1 %vm807_vm0, %v6680_v13 }
  0x67   : > { %5614 = vmatmul.mubr.msk.bf16.gmra.mrb[8].mxu0 %vm807_vm0, %v7035_v53  ;;  %5749 = vmatprep.mubr.msk.bf16.mxu1 %vm807_vm0, %v6693_v19 }
  0x68   : > { %5617 = vmatprep.mubr.msk.bf16.mxu0 %vm807_vm0, %v7041_v61 }
  0x6e   : > { %5750 = vmatmul.mubr.msk.bf16.gmra.mrb[8].mxu1 %vm807_vm0, %v6722_v31 }
  0x6f   : > { %5618 = vmatmul.mubr.msk.bf16.gmra.mrb[12].mxu0 %vm807_vm0, %v7059_v56  ;;  %5753 = vmatprep.mubr.msk.bf16.mxu1 %vm807_vm0, %v6730_v35 }
  0x70   : > { %5621 = vmatprep.mubr.msk.bf16.mxu0 %vm807_vm0, %v7065_v11 }
  0x76   : > { %5754 = vmatmul.mubr.msk.bf16.gmra.mrb[12].mxu1 %vm807_vm0, %v6753_v42 }
  0x77   : > { %5622 = vmatmul.mubr.msk.bf16.gmra.mrb[16].mxu0 %vm807_vm0, %v7083_v3  ;;  %5757 = vmatprep.mubr.msk.bf16.mxu1 %vm807_vm0, %v6769_v48 }
  0x78   : > { %5625 = vmatprep.mubr.msk.bf16.mxu0 %vm807_vm0, %v7089_v12 }
  0x7e   : > { %5758 = vmatmul.mubr.msk.bf16.gmra.mrb[16].mxu1 %vm807_vm0, %v6791_v54 }
  0x7f   : > { %5626 = vmatmul.mubr.msk.bf16.gmra.mrb[20].mxu0 %vm807_vm0, %v7107_v41  ;;  %5761 = vmatprep.mubr.msk.bf16.mxu1 %vm807_vm0, %v6814_v62 }
  0x80   : > { %5629 = vmatprep.mubr.msk.bf16.mxu0 %vm807_vm0, %v7113_v57 }
  0x86   : > { %5762 = vmatmul.mubr.msk.bf16.gmra.mrb[20].mxu1 %vm807_vm0, %v6835_v5 }
  0x87   : > { %5630 = vmatmul.mubr.msk.bf16.gmra.mrb[24].mxu0 %vm807_vm0, %v7131_v28  ;;  %5765 = vmatprep.mubr.msk.bf16.mxu1 %vm807_vm0, %v6843_v16 }
  0x88   : > { %5633 = vmatprep.mubr.msk.bf16.mxu0 %vm807_vm0, %v7137_v7 }
  0x8e   : > { %5766 = vmatmul.mubr.msk.bf16.gmra.mrb[24].mxu1 %vm807_vm0, %v6873_v39 }
  0x8f   : > { %5634 = vmatmul.mubr.msk.bf16.gmra.mrb[28].mxu0 %vm807_vm0, %v7151_v23  ;;  %5769 = vmatprep.mubr.msk.bf16.mxu1 %vm807_vm0, %v6883_v51 }
  0x90   : > { %5639 = vmatprep.mubr.msk.bf16.mxu0 %vm807_vm0, %v6973_v14 }
  0x96   : > { %5770 = vmatmul.mubr.msk.bf16.gmra.mrb[28].mxu1 %vm807_vm0, %v6907_v30 }
  0x97   : > { %5640 = vmatmul.mubr.msk.bf16.vlgmr.msra.gmra.mrb[0].mxu0 %vm807_vm0, %v6979_v47  ;;  %5775 = vmatprep.mubr.msk.bf16.mxu1 %vm807_vm0, %v6670_v6 }
  0x98   : > { %5643 = vmatprep.mubr.msk.bf16.mxu0 %vm807_vm0, %v7004_v34  ;;  %5672 = vmatpush3.bf16.msra.mxu0 %v6986_v18  ;;  %v7210_v18 = vld [vmem:[%s6660_s6 + $0x78] sm:$0xff]  }
  0x99   : > { %5841 = vmatprep.subr.bf16.mxu0 %v6547_v33  ;;  %v671_v9 = vshll.u32 %v7210_v18, 16 }
  0x9b   : > { %v752_v40 = vrot.slane %v671_v9, 1 }
  0x9e   : > { %5776 = vmatmul.mubr.msk.bf16.vlgmr.msra.gmra.mrb[0].mxu1 %vm807_vm0, %v6675_v10 }
  0x9f   : > { %5808 = vmatpush3.bf16.msra.mxu1 %v7017_v25  ;;  %5644 = vmatmul.mubr.msk.bf16.gmra.mrb[4].mxu0 %vm807_vm0, %v7010_v15  ;;  %v668_v25 = vshrl.u32 %v7210_v18, 16 }
  0xa0   : > { %5779 = vmatprep.mubr.msk.bf16.mxu1 %vm807_vm0, %v6680_v13  ;;  %5647 = vmatprep.mubr.msk.bf16.mxu0 %vm807_vm0, %v7035_v53 }
  0xa1   : > { %5977 = vmatprep.subr.bf16.mxu1 %v6546_v63  ;;  %v670_v2 = vrot.slane %v668_v25, 7  ;;  %v753_v60 = vor.u32 %v752_v40, %v668_v25  ;;  %v444_v25 = vld [vmem:[%s376_s28] sm:$0xf] }
  0xa3   : > { %v673_v22 = vor.u32 %v671_v9, %v670_v2  ;;  %v7314_v1 = vsel %vm6698_vm3, %v753_v60, 0  ;;  %v445_v60 = vld [vmem:[%s376_s28 + $0x4] sm:$0xf] }
  0xa5   : > { %v7232_v46 = vsel %vm6933_vm6, 0, %v673_v22 }
  0xa6   : > { %5780 = vmatmul.mubr.msk.bf16.gmra.mrb[4].mxu1 %vm807_vm0, %v6693_v19 }
  0xa7   : > { %5648 = vmatmul.mubr.msk.bf16.gmra.mrb[8].mxu0 %vm807_vm0, %v7041_v61  ;;  %5783 = vmatprep.mubr.msk.bf16.mxu1 %vm807_vm0, %v6722_v31 }
  0xa8   : > { %5651 = vmatprep.mubr.msk.bf16.mxu0 %vm807_vm0, %v7059_v56 }
  0xae   : > { %5784 = vmatmul.mubr.msk.bf16.gmra.mrb[8].mxu1 %vm807_vm0, %v6730_v35 }
  0xaf   : > { %5652 = vmatmul.mubr.msk.bf16.gmra.mrb[12].mxu0 %vm807_vm0, %v7065_v11  ;;  %5787 = vmatprep.mubr.msk.bf16.mxu1 %vm807_vm0, %v6753_v42 }
  0xb0   : > { %5655 = vmatprep.mubr.msk.bf16.mxu0 %vm807_vm0, %v7083_v3 }
  0xb6   : > { %5788 = vmatmul.mubr.msk.bf16.gmra.mrb[12].mxu1 %vm807_vm0, %v6769_v48 }
  0xb7   : > { %5656 = vmatmul.mubr.msk.bf16.gmra.mrb[16].mxu0 %vm807_vm0, %v7089_v12  ;;  %5791 = vmatprep.mubr.msk.bf16.mxu1 %vm807_vm0, %v6791_v54 }
  0xb8   : > { %5659 = vmatprep.mubr.msk.bf16.mxu0 %vm807_vm0, %v7107_v41 }
  0xbe   : > { %5792 = vmatmul.mubr.msk.bf16.gmra.mrb[16].mxu1 %vm807_vm0, %v6814_v62 }
  0xbf   : > { %5660 = vmatmul.mubr.msk.bf16.gmra.mrb[20].mxu0 %vm807_vm0, %v7113_v57  ;;  %5795 = vmatprep.mubr.msk.bf16.mxu1 %vm807_vm0, %v6835_v5 }
  0xc0   : > { %5663 = vmatprep.mubr.msk.bf16.mxu0 %vm807_vm0, %v7131_v28 }
  0xc6   : > { %5796 = vmatmul.mubr.msk.bf16.gmra.mrb[20].mxu1 %vm807_vm0, %v6843_v16 }
  0xc7   : > { %5664 = vmatmul.mubr.msk.bf16.gmra.mrb[24].mxu0 %vm807_vm0, %v7137_v7  ;;  %5799 = vmatprep.mubr.msk.bf16.mxu1 %vm807_vm0, %v6873_v39 }
  0xc8   : > { %5667 = vmatprep.mubr.msk.bf16.mxu0 %vm807_vm0, %v7151_v23 }
  0xce   : > { %5800 = vmatmul.mubr.msk.bf16.gmra.mrb[24].mxu1 %vm807_vm0, %v6883_v51 }
  0xcf   : > { %5668 = vmatmul.mubr.msk.bf16.gmra.mrb[28].mxu0 %vm807_vm0, %v7232_v46  ;;  %5803 = vmatprep.mubr.msk.bf16.mxu1 %vm807_vm0, %v6907_v30 }
  0xd0   : > { %5673 = vmatprep.mubr.msk.bf16.mxu0 %vm807_vm0, %v6670_v6 }
  0xd6   : > { %5804 = vmatmul.mubr.msk.bf16.gmra.mrb[28].mxu1 %vm807_vm0, %v7210_v18 }
  0xd7   : > { %5674 = vmatmul.mubr.msk.bf16.vlgmr.msra.gmra.mrb[0].mxu0 %vm807_vm0, %v6675_v10  ;;  %5809 = vmatprep.mubr.msk.bf16.mxu1 %vm807_vm0, %v6714_v27 }
  0xd8   : > { %5677 = vmatprep.mubr.msk.bf16.mxu0 %vm807_vm0, %v6680_v13  ;;  %5842 = vmatpush3.bf16.msra.mxu0 %v6547_v33 }
  0xd9   : > { %5875 = vmatprep.subr.bf16.mxu0 %v6549_v58 }
  0xde   : > { %5810 = vmatmul.mubr.msk.bf16.vlgmr.msra.gmra.mrb[0].mxu1 %vm807_vm0, %v6735_v36 }
  0xdf   : > { %5978 = vmatpush3.bf16.msra.mxu1 %v6546_v63  ;;  %5678 = vmatmul.mubr.msk.bf16.gmra.mrb[4].mxu0 %vm807_vm0, %v6693_v19 }
  0xe0   : > { %5813 = vmatprep.mubr.msk.bf16.mxu1 %vm807_vm0, %v6757_v43  ;;  %5681 = vmatprep.mubr.msk.bf16.mxu0 %vm807_vm0, %v6722_v31 }
  0xe1   : > { %6011 = vmatprep.subr.bf16.mxu1 %v6548_v38 }
  0xe6   : > { %5814 = vmatmul.mubr.msk.bf16.gmra.mrb[4].mxu1 %vm807_vm0, %v6763_v45 }
  0xe7   : > { %5682 = vmatmul.mubr.msk.bf16.gmra.mrb[8].mxu0 %vm807_vm0, %v6730_v35  ;;  %5817 = vmatprep.mubr.msk.bf16.mxu1 %vm807_vm0, %v6795_v55 }
  0xe8   : > { %5685 = vmatprep.mubr.msk.bf16.mxu0 %vm807_vm0, %v6753_v42 }
  0xee   : > { %5818 = vmatmul.mubr.msk.bf16.gmra.mrb[8].mxu1 %vm807_vm0, %v6808_v59 }
  0xef   : > { %5686 = vmatmul.mubr.msk.bf16.gmra.mrb[12].mxu0 %vm807_vm0, %v6769_v48  ;;  %5821 = vmatprep.mubr.msk.bf16.mxu1 %vm807_vm0, %v6840_v8 }
  0xf0   : > { %5689 = vmatprep.mubr.msk.bf16.mxu0 %vm807_vm0, %v6791_v54 }
  0xf6   : > { %5822 = vmatmul.mubr.msk.bf16.gmra.mrb[12].mxu1 %vm807_vm0, %v6847_v20 }
  0xf7   : > { %5690 = vmatmul.mubr.msk.bf16.gmra.mrb[16].mxu0 %vm807_vm0, %v6814_v62  ;;  %5825 = vmatprep.mubr.msk.bf16.mxu1 %vm807_vm0, %v6867_v32 }
  0xf8   : > { %5693 = vmatprep.mubr.msk.bf16.mxu0 %vm807_vm0, %v6835_v5 }
  0xfe   : > { %5826 = vmatmul.mubr.msk.bf16.gmra.mrb[16].mxu1 %vm807_vm0, %v6877_v44 }
  0xff   : > { %5694 = vmatmul.mubr.msk.bf16.gmra.mrb[20].mxu0 %vm807_vm0, %v6843_v16  ;;  %5829 = vmatprep.mubr.msk.bf16.mxu1 %vm807_vm0, %v6901_v4 }
 0x100   : > { %5697 = vmatprep.mubr.msk.bf16.mxu0 %vm807_vm0, %v6873_v39 }
 0x106   : > { %5830 = vmatmul.mubr.msk.bf16.gmra.mrb[20].mxu1 %vm807_vm0, %v6911_v37 }
 0x107   : > { %5698 = vmatmul.mubr.msk.bf16.gmra.mrb[24].mxu0 %vm807_vm0, %v6883_v51  ;;  %5833 = vmatprep.mubr.msk.bf16.mxu1 %vm807_vm0, %v6939_v24 }
 0x108   : > { %5701 = vmatprep.mubr.msk.bf16.mxu0 %vm807_vm0, %v6907_v30 }
 0x10e   : > { %5834 = vmatmul.mubr.msk.bf16.gmra.mrb[24].mxu1 %vm807_vm0, %v6948_v49 }
 0x10f   : > { %5702 = vmatmul.mubr.msk.bf16.gmra.mrb[28].mxu0 %vm807_vm0, %v7210_v18  ;;  %5837 = vmatprep.mubr.msk.bf16.mxu1 %vm807_vm0, %v6969_v0 }
 0x110   : > { %5843 = vmatprep.mubr.msk.bf16.mxu0 %vm807_vm0, %v6670_v6 }
 0x116   : > { %5838 = vmatmul.mubr.msk.bf16.gmra.mrb[28].mxu1 %vm807_vm0, %v7314_v1 }
 0x117   : > { %5844 = vmatmul.mubr.msk.bf16.vlgmr.msra.gmra.mrb[32].mxu0 %vm807_vm0, %v6675_v10  ;;  %5979 = vmatprep.mubr.msk.bf16.mxu1 %vm807_vm0, %v6714_v27  ;;  %v6553_v27 = vld [vmem:[%s8046_s3 + $0x58] sm:$0xff]  }
 0x118   : > { %5847 = vmatprep.mubr.msk.bf16.mxu0 %vm807_vm0, %v6680_v13  ;;  %5876 = vmatpush3.bf16.msra.mxu0 %v6549_v58 }
 0x119   : > { %5909 = vmatprep.subr.bf16.mxu0 %v6551_v50 }
 0x11e   : > { %5980 = vmatmul.mubr.msk.bf16.vlgmr.msra.gmra.mrb[32].mxu1 %vm807_vm0, %v6735_v36 }
 0x11f   : > { %6012 = vmatpush3.bf16.msra.mxu1 %v6548_v38  ;;  %5848 = vmatmul.mubr.msk.bf16.gmra.mrb[36].mxu0 %vm807_vm0, %v6693_v19 }
 0x120   : > { %5983 = vmatprep.mubr.msk.bf16.mxu1 %vm807_vm0, %v6757_v43  ;;  %5851 = vmatprep.mubr.msk.bf16.mxu0 %vm807_vm0, %v6722_v31 }
 0x121   : > { %6045 = vmatprep.subr.bf16.mxu1 %v6550_v52 }
 0x126   : > { %5984 = vmatmul.mubr.msk.bf16.gmra.mrb[36].mxu1 %vm807_vm0, %v6763_v45 }
 0x127   : > { %5852 = vmatmul.mubr.msk.bf16.gmra.mrb[40].mxu0 %vm807_vm0, %v6730_v35  ;;  %5987 = vmatprep.mubr.msk.bf16.mxu1 %vm807_vm0, %v6795_v55 }
 0x128   : > { %5855 = vmatprep.mubr.msk.bf16.mxu0 %vm807_vm0, %v6753_v42 }
 0x12e   : > { %5988 = vmatmul.mubr.msk.bf16.gmra.mrb[40].mxu1 %vm807_vm0, %v6808_v59 }
 0x12f   : > { %5856 = vmatmul.mubr.msk.bf16.gmra.mrb[44].mxu0 %vm807_vm0, %v6769_v48  ;;  %5991 = vmatprep.mubr.msk.bf16.mxu1 %vm807_vm0, %v6840_v8 }
 0x130   : > { %5859 = vmatprep.mubr.msk.bf16.mxu0 %vm807_vm0, %v6791_v54 }
 0x136   : > { %5992 = vmatmul.mubr.msk.bf16.gmra.mrb[44].mxu1 %vm807_vm0, %v6847_v20 }
 0x137   : > { %5860 = vmatmul.mubr.msk.bf16.gmra.mrb[48].mxu0 %vm807_vm0, %v6814_v62  ;;  %5995 = vmatprep.mubr.msk.bf16.mxu1 %vm807_vm0, %v6867_v32 }
 0x138   : > { %5863 = vmatprep.mubr.msk.bf16.mxu0 %vm807_vm0, %v6835_v5 }
 0x13e   : > { %5996 = vmatmul.mubr.msk.bf16.gmra.mrb[48].mxu1 %vm807_vm0, %v6877_v44 }
 0x13f   : > { %5864 = vmatmul.mubr.msk.bf16.gmra.mrb[52].mxu0 %vm807_vm0, %v6843_v16  ;;  %5999 = vmatprep.mubr.msk.bf16.mxu1 %vm807_vm0, %v6901_v4 }
 0x140   : > { %5867 = vmatprep.mubr.msk.bf16.mxu0 %vm807_vm0, %v6873_v39 }
 0x146   : > { %6000 = vmatmul.mubr.msk.bf16.gmra.mrb[52].mxu1 %vm807_vm0, %v6911_v37 }
 0x147   : > { %5868 = vmatmul.mubr.msk.bf16.gmra.mrb[56].mxu0 %vm807_vm0, %v6883_v51  ;;  %6003 = vmatprep.mubr.msk.bf16.mxu1 %vm807_vm0, %v6939_v24 }
 0x148   : > { %5871 = vmatprep.mubr.msk.bf16.mxu0 %vm807_vm0, %v6907_v30 }
 0x14e   : > { %6004 = vmatmul.mubr.msk.bf16.gmra.mrb[56].mxu1 %vm807_vm0, %v6948_v49 }
 0x14f   : > { %5872 = vmatmul.mubr.msk.bf16.gmra.mrb[60].mxu0 %vm807_vm0, %v7210_v18  ;;  %6007 = vmatprep.mubr.msk.bf16.mxu1 %vm807_vm0, %v6969_v0 }
 0x150   : > { %5877 = vmatprep.mubr.msk.bf16.mxu0 %vm807_vm0, %v6973_v14  ;;  %v6552_v14 = vld [vmem:[%s8046_s3 + $0x78] sm:$0xff]  }
 0x156   : > { %6008 = vmatmul.mubr.msk.bf16.gmra.mrb[60].mxu1 %vm807_vm0, %v7314_v1 }
 0x157   : > { %5878 = vmatmul.mubr.msk.bf16.vlgmr.msra.gmra.mrb[32].mxu0 %vm807_vm0, %v6979_v47  ;;  %6013 = vmatprep.mubr.msk.bf16.mxu1 %vm807_vm0, %v6670_v6  ;;  %v7481_v6 = vld [vmem:[%s8047_s4] ss:$0 sm:$0xff] }
 0x158   : > { %5881 = vmatprep.mubr.msk.bf16.mxu0 %vm807_vm0, %v7004_v34  ;;  %5910 = vmatpush3.bf16.msra.mxu0 %v6551_v50 }
 0x159   : > { %5943 = vmatprep.subr.bf16.mxu0 %v6553_v27 }
 0x15e   : > { %6014 = vmatmul.mubr.msk.bf16.vlgmr.msra.gmra.mrb[32].mxu1 %vm807_vm0, %v6675_v10 }
 0x15f   : > { %6046 = vmatpush3.bf16.msra.mxu1 %v6550_v52  ;;  %5882 = vmatmul.mubr.msk.bf16.gmra.mrb[36].mxu0 %vm807_vm0, %v7010_v15 }
 0x160   : > { %6017 = vmatprep.mubr.msk.bf16.mxu1 %vm807_vm0, %v6680_v13  ;;  %5885 = vmatprep.mubr.msk.bf16.mxu0 %vm807_vm0, %v7035_v53 }
 0x161   : > { %6079 = vmatprep.subr.bf16.mxu1 %v6552_v14 }
 0x166   : > { %6018 = vmatmul.mubr.msk.bf16.gmra.mrb[36].mxu1 %vm807_vm0, %v6693_v19 }
 0x167   : > { %5886 = vmatmul.mubr.msk.bf16.gmra.mrb[40].mxu0 %vm807_vm0, %v7041_v61  ;;  %6021 = vmatprep.mubr.msk.bf16.mxu1 %vm807_vm0, %v6722_v31 }
 0x168   : > { %5889 = vmatprep.mubr.msk.bf16.mxu0 %vm807_vm0, %v7059_v56 }
 0x16e   : > { %6022 = vmatmul.mubr.msk.bf16.gmra.mrb[40].mxu1 %vm807_vm0, %v6730_v35 }
 0x16f   : > { %5890 = vmatmul.mubr.msk.bf16.gmra.mrb[44].mxu0 %vm807_vm0, %v7065_v11  ;;  %6025 = vmatprep.mubr.msk.bf16.mxu1 %vm807_vm0, %v6753_v42 }
 0x170   : > { %5893 = vmatprep.mubr.msk.bf16.mxu0 %vm807_vm0, %v7083_v3 }
 0x176   : > { %6026 = vmatmul.mubr.msk.bf16.gmra.mrb[44].mxu1 %vm807_vm0, %v6769_v48 }
 0x177   : > { %5894 = vmatmul.mubr.msk.bf16.gmra.mrb[48].mxu0 %vm807_vm0, %v7089_v12  ;;  %6029 = vmatprep.mubr.msk.bf16.mxu1 %vm807_vm0, %v6791_v54 }
 0x178   : > { %5897 = vmatprep.mubr.msk.bf16.mxu0 %vm807_vm0, %v7107_v41 }
 0x17e   : > { %6030 = vmatmul.mubr.msk.bf16.gmra.mrb[48].mxu1 %vm807_vm0, %v6814_v62 }
 0x17f   : > { %5898 = vmatmul.mubr.msk.bf16.gmra.mrb[52].mxu0 %vm807_vm0, %v7113_v57  ;;  %6033 = vmatprep.mubr.msk.bf16.mxu1 %vm807_vm0, %v6835_v5 }
 0x180   : > { %5901 = vmatprep.mubr.msk.bf16.mxu0 %vm807_vm0, %v7131_v28 }
 0x186   : > { %6034 = vmatmul.mubr.msk.bf16.gmra.mrb[52].mxu1 %vm807_vm0, %v6843_v16 }
 0x187   : > { %5902 = vmatmul.mubr.msk.bf16.gmra.mrb[56].mxu0 %vm807_vm0, %v7137_v7  ;;  %6037 = vmatprep.mubr.msk.bf16.mxu1 %vm807_vm0, %v6873_v39 }
 0x188   : > { %5905 = vmatprep.mubr.msk.bf16.mxu0 %vm807_vm0, %v7151_v23 }
 0x18e   : > { %6038 = vmatmul.mubr.msk.bf16.gmra.mrb[56].mxu1 %vm807_vm0, %v6883_v51 }
 0x18f   : > { %5906 = vmatmul.mubr.msk.bf16.gmra.mrb[60].mxu0 %vm807_vm0, %v7232_v46  ;;  %6041 = vmatprep.mubr.msk.bf16.mxu1 %vm807_vm0, %v6907_v30 }
 0x190   : > { %5911 = vmatprep.mubr.msk.bf16.mxu0 %vm807_vm0, %v6979_v47 }
 0x196   : > { %6042 = vmatmul.mubr.msk.bf16.gmra.mrb[60].mxu1 %vm807_vm0, %v7210_v18 }
 0x197   : > { %5912 = vmatmul.mubr.msk.bf16.vlgmr.msra.gmra.mrb[32].mxu0 %vm807_vm0, %v7004_v34  ;;  %6047 = vmatprep.mubr.msk.bf16.mxu1 %vm807_vm0, %v6675_v10 }
 0x198   : > { %5915 = vmatprep.mubr.msk.bf16.mxu0 %vm807_vm0, %v7010_v15  ;;  %5944 = vmatpush3.bf16.msra.mxu0 %v6553_v27 }
 0x19e   : > { %6048 = vmatmul.mubr.msk.bf16.vlgmr.msra.gmra.mrb[32].mxu1 %vm807_vm0, %v6680_v13 }
 0x19f   : > { %6080 = vmatpush3.bf16.msra.mxu1 %v6552_v14  ;;  %5916 = vmatmul.mubr.msk.bf16.gmra.mrb[36].mxu0 %vm807_vm0, %v7035_v53  ;;  %v463_v14 = vmul.bf16 0.0, %v444_v25 }
 0x1a0   : > { %6051 = vmatprep.mubr.msk.bf16.mxu1 %vm807_vm0, %v6693_v19  ;;  %5919 = vmatprep.mubr.msk.bf16.mxu0 %vm807_vm0, %v7041_v61 }
 0x1a6   : > { %6052 = vmatmul.mubr.msk.bf16.gmra.mrb[36].mxu1 %vm807_vm0, %v6722_v31 }
 0x1a7   : > { %5920 = vmatmul.mubr.msk.bf16.gmra.mrb[40].mxu0 %vm807_vm0, %v7059_v56  ;;  %6055 = vmatprep.mubr.msk.bf16.mxu1 %vm807_vm0, %v6730_v35 }
 0x1a8   : > { %5923 = vmatprep.mubr.msk.bf16.mxu0 %vm807_vm0, %v7065_v11 }
 0x1aa   : > { %v5675_v10 = vpop.f32.mrb[0].mxu0 }
 0x1ab   : > { %v1633_v13 = vadd.f32 %v5675_v10, %v7481_v6  ;;  %v1466_v19 = vpop.f32.mrb[1].mxu0 }
 0x1ac   : > { %v1631_v31 = vadd.f32 %v7481_v6, %v1466_v19  ;;  %v5676_v47 = vpop.f32.mrb[2].mxu0 }
 0x1ad   : > { %v1634_v34 = vadd.f32 %v5676_v47, %v7481_v6  ;;  %v1469_v15 = vpop.f32.mrb[3].mxu0  ;;  %v1665_v53 = vmax.f32 %v1633_v13, 0.0 }
 0x1ae   : > { %v1632_v35 = vadd.f32 %v7481_v6, %v1469_v15  ;;  %6056 = vmatmul.mubr.msk.bf16.gmra.mrb[40].mxu1 %vm807_vm0, %v6753_v42  ;;  %v1663_v56 = vmax.f32 %v1631_v31, 0.0 }
 0x1af   : > { %v1666_v61 = vmax.f32 %v1634_v34, 0.0  ;;  %5924 = vmatmul.mubr.msk.bf16.gmra.mrb[44].mxu0 %vm807_vm0, %v7083_v3  ;;  %6059 = vmatprep.mubr.msk.bf16.mxu1 %vm807_vm0, %v6769_v48 }
 0x1b0   : > { %v1664_v11 = vmax.f32 %v1632_v35, 0.0  ;;  %5927 = vmatprep.mubr.msk.bf16.mxu0 %vm807_vm0, %v7089_v12  ;;  %v464_v35 = vmul.bf16 0.0, %v445_v60 }
 0x1b1   : > { %v7501_v17 = vpack.c.bf16 %v1666_v61, %v1665_v53  ;;  %v5811_v42 = vpop.f32.mrb[0].mxu1 }
 0x1b2   : > { %v7503_v29 = vpack.c.bf16 %v1664_v11, %v1663_v56  ;;  %v2508_v33 = vadd.f32 %v5811_v42, %v7481_v6  ;;  %v5679_v3 = vpop.f32.mrb[4].mxu0  ;;  %v2347_v63 = vpop.f32.mrb[1].mxu1 }
 0x1b3   : > { %v1637_v48 = vadd.f32 %v5679_v3, %v7481_v6  ;;  %v2506_v2 = vadd.f32 %v7481_v6, %v2347_v63  ;;  %v1482_v9 = vpop.f32.mrb[5].mxu0  ;;  %v5812_v22 = vpop.f32.mrb[2].mxu1 }
 0x1b4   : > { %v1635_v58 = vadd.f32 %v7481_v6, %v1482_v9  ;;  %v2509_v12 = vadd.f32 %v5812_v22, %v7481_v6  ;;  %v5680_v38 = vpop.f32.mrb[6].mxu0  ;;  %v2350_v40 = vpop.f32.mrb[3].mxu1  ;;  %v2540_v10 = vmax.f32 %v2508_v33, 0.0 }
 0x1b5   : > { %v1638_v50 = vadd.f32 %v5680_v38, %v7481_v6  ;;  %v2507_v52 = vadd.f32 %v7481_v6, %v2350_v40  ;;  %v1485_v27 = vpop.f32.mrb[7].mxu0  ;;  %v1669_v31 = vmax.f32 %v1637_v48, 0.0  ;;  %v2538_v47 = vmax.f32 %v2506_v2, 0.0 }
 0x1b6   : > { %v2541_v13 = vmax.f32 %v2509_v12, 0.0  ;;  %v1636_v19 = vadd.f32 %v7481_v6, %v1485_v27  ;;  %6060 = vmatmul.mubr.msk.bf16.gmra.mrb[44].mxu1 %vm807_vm0, %v6791_v54  ;;  %v1667_v53 = vmax.f32 %v1635_v58, 0.0  ;;  %v7531_v12 = vcombine.low %v463_v14, %v464_v35 }
 0x1b7   : > { %v1670_v34 = vmax.f32 %v1638_v50, 0.0  ;;  %v2539_v15 = vmax.f32 %v2507_v52, 0.0  ;;  %5928 = vmatmul.mubr.msk.bf16.gmra.mrb[48].mxu0 %vm807_vm0, %v7107_v41  ;;  %6063 = vmatprep.mubr.msk.bf16.mxu1 %vm807_vm0, %v6814_v62 }
 0x1b8   : > { %v1668_v61 = vmax.f32 %v1636_v19, 0.0  ;;  %v2571_v56 = vpack.c.bf16 %v2541_v13, %v2540_v10  ;;  %5931 = vmatprep.mubr.msk.bf16.mxu0 %vm807_vm0, %v7113_v57 }
 0x1b9   : > { %v7521_v11 = vpack.c.bf16 %v1670_v34, %v1669_v31  ;;  %v2570_v54 = vpack.c.bf16 %v2539_v15, %v2538_v47  ;;  %v5815_v42 = vpop.f32.mrb[4].mxu1 }
 0x1ba   : > { %v7523_v33 = vpack.c.bf16 %v1668_v61, %v1667_v53  ;;  %v2512_v3 = vadd.f32 %v5815_v42, %v7481_v6  ;;  %2604 = vrot.lane.b32.xlu0 %v2571_v56, %s6593_s26  ;;  %v5683_v41 = vpop.f32.mrb[8].mxu0  ;;  %v2363_v62 = vpop.f32.mrb[5].mxu1 }
 0x1bb   : > { %v1641_v63 = vadd.f32 %v5683_v41, %v7481_v6  ;;  %v2510_v25 = vadd.f32 %v7481_v6, %v2363_v62  ;;  %v1498_v48 = vpop.f32.mrb[9].mxu0  ;;  %v5816_v2 = vpop.f32.mrb[6].mxu1 }
 0x1bc   : > { %v1639_v57 = vadd.f32 %v7481_v6, %v1498_v48  ;;  %v2513_v9 = vadd.f32 %v5816_v2, %v7481_v6  ;;  %v5684_v22 = vpop.f32.mrb[10].mxu0  ;;  %v2366_v58 = vpop.f32.mrb[7].mxu1  ;;  %v2544_v50 = vmax.f32 %v2512_v3, 0.0  ;;  %v678_v2 = vshll.u32 %v7531_v12, 16 }
 0x1bd   : > { %v1642_v38 = vadd.f32 %v5684_v22, %v7481_v6  ;;  %v2511_v40 = vadd.f32 %v7481_v6, %v2366_v58  ;;  %v1501_v60 = vpop.f32.mrb[11].mxu0  ;;  %v1673_v10 = vmax.f32 %v1641_v63, 0.0  ;;  %v2542_v13 = vmax.f32 %v2510_v25, 0.0 }
 0x1be   : > { %v2545_v52 = vmax.f32 %v2513_v9, 0.0  ;;  %v1640_v27 = vadd.f32 %v7481_v6, %v1501_v60  ;;  %6064 = vmatmul.mubr.msk.bf16.gmra.mrb[48].mxu1 %vm807_vm0, %v6835_v5  ;;  %2602 = vrot.lane.b32.xlu0 %v2570_v54, %s6593_s26  ;;  %v1671_v14 = vmax.f32 %v1639_v57, 0.0  ;;  %v675_v5 = vshrl.u32 %v7531_v12, 16 }
 0x1bf   : > { %v1674_v19 = vmax.f32 %v1642_v38, 0.0  ;;  %v2543_v31 = vmax.f32 %v2511_v40, 0.0  ;;  %5932 = vmatmul.mubr.msk.bf16.gmra.mrb[52].mxu0 %vm807_vm0, %v7131_v28  ;;  %6067 = vmatprep.mubr.msk.bf16.mxu1 %vm807_vm0, %v6843_v16 }
 0x1c0   : > { %v1672_v47 = vmax.f32 %v1640_v27, 0.0  ;;  %v2573_v34 = vpack.c.bf16 %v2545_v52, %v2544_v50  ;;  %5935 = vmatprep.mubr.msk.bf16.mxu0 %vm807_vm0, %v7137_v7  ;;  %v677_v48 = vrot.slane %v675_v5, 7 }
 0x1c1   : > { %v7546_v15 = vpack.c.bf16 %v1674_v19, %v1673_v10  ;;  %v2572_v35 = vpack.c.bf16 %v2543_v31, %v2542_v13  ;;  %v5819_v53 = vpop.f32.mrb[8].mxu1 }
 0x1c2   : > { %v7548_v61 = vpack.c.bf16 %v1672_v47, %v1671_v14  ;;  %v2516_v56 = vadd.f32 %v5819_v53, %v7481_v6  ;;  %2608 = vrot.lane.b32.xlu1 %v2573_v34, %s6593_s26  ;;  %v5687_v28 = vpop.f32.mrb[12].mxu0  ;;  %v2379_v16 = vpop.f32.mrb[9].mxu1 }
 0x1c3   : > { %v1645_v54 = vadd.f32 %v5687_v28, %v7481_v6  ;;  %v2514_v42 = vadd.f32 %v7481_v6, %v2379_v16  ;;  %v1514_v3 = vpop.f32.mrb[13].mxu0  ;;  %v5820_v7 = vpop.f32.mrb[10].mxu1 }
 0x1c4   : > { %v1643_v41 = vadd.f32 %v7481_v6, %v1514_v3  ;;  %v2517_v62 = vadd.f32 %v5820_v7, %v7481_v6  ;;  %v5688_v63 = vpop.f32.mrb[14].mxu0  ;;  %v2382_v25 = vpop.f32.mrb[11].mxu1  ;;  %v2548_v58 = vmax.f32 %v2516_v56, 0.0 }
 0x1c5   : > { %v1646_v57 = vadd.f32 %v5688_v63, %v7481_v6  ;;  %v2515_v9 = vadd.f32 %v7481_v6, %v2382_v25  ;;  %v1517_v22 = vpop.f32.mrb[15].mxu0  ;;  %v1677_v60 = vmax.f32 %v1645_v54, 0.0  ;;  %v2546_v50 = vmax.f32 %v2514_v42, 0.0 }
 0x1c6   : > { %v2549_v38 = vmax.f32 %v2517_v62, 0.0  ;;  %v1644_v40 = vadd.f32 %v7481_v6, %v1517_v22  ;;  %6068 = vmatmul.mubr.msk.bf16.gmra.mrb[52].mxu1 %vm807_vm0, %v6873_v39  ;;  %2606 = vrot.lane.b32.xlu1 %v2572_v35, %s6593_s26  ;;  %v1675_v10 = vmax.f32 %v1643_v41, 0.0  ;;  %v680_v39 = vor.u32 %v678_v2, %v677_v48 }
 0x1c7   : > { %v1678_v52 = vmax.f32 %v1646_v57, 0.0  ;;  %v2547_v27 = vmax.f32 %v2515_v9, 0.0  ;;  %5936 = vmatmul.mubr.msk.bf16.gmra.mrb[56].mxu0 %vm807_vm0, %v7151_v23  ;;  %6071 = vmatprep.mubr.msk.bf16.mxu1 %vm807_vm0, %v6883_v51 }
 0x1c8   : > { %v2575_v13 = vpack.c.bf16 %v2549_v38, %v2548_v58  ;;  %v1676_v19 = vmax.f32 %v1644_v40, 0.0  ;;  %5939 = vmatprep.mubr.msk.bf16.mxu0 %vm807_vm0, %v7232_v46  ;;  %v719_v7 = vsel %vm6933_vm6, 0, %v680_v39 }
 0x1c9   : > { %v7573_v31 = vpack.c.bf16 %v1678_v52, %v1677_v60  ;;  %v2574_v14 = vpack.c.bf16 %v2547_v27, %v2546_v50  ;;  %v5823_v47 = vpop.f32.mrb[12].mxu1  ;;  %v6554_v50 = vld [vmem:[%s6660_s6 + $0x8] sm:$0xff]  }
 0x1ca   : > { %v7575_v34 = vpack.c.bf16 %v1676_v19, %v1675_v10  ;;  %v2520_v23 = vadd.f32 %v5823_v47, %v7481_v6  ;;  %2612 = vrot.lane.b32.xlu1 %v2575_v13, %s6593_s26  ;;  %v5691_v51 = vpop.f32.mrb[16].mxu0  ;;  %v2395_v35 = vpop.f32.mrb[13].mxu1 }
 0x1cb   : > { %v1649_v53 = vadd.f32 %v5691_v51, %v7481_v6  ;;  %v2518_v56 = vadd.f32 %v7481_v6, %v2395_v35  ;;  %2610 = vrot.lane.b32.xlu0 %v2574_v14, %s6593_s26  ;;  %v1530_v46 = vpop.f32.mrb[17].mxu0  ;;  %v5824_v28 = vpop.f32.mrb[14].mxu1 }
 0x1cc   : > { %v1647_v16 = vadd.f32 %v7481_v6, %v1530_v46  ;;  %v2521_v54 = vadd.f32 %v5824_v28, %v7481_v6  ;;  %v5692_v42 = vpop.f32.mrb[18].mxu0  ;;  %v2398_v3 = vpop.f32.mrb[15].mxu1  ;;  %v2552_v25 = vmax.f32 %v2520_v23, 0.0 }
 0x1cd   : > { %v1650_v41 = vadd.f32 %v5692_v42, %v7481_v6  ;;  %v2519_v62 = vadd.f32 %v7481_v6, %v2398_v3  ;;  %v1533_v63 = vpop.f32.mrb[19].mxu0  ;;  %v1681_v9 = vmax.f32 %v1649_v53, 0.0  ;;  %v2550_v22 = vmax.f32 %v2518_v56, 0.0 }
 0x1ce   : > { %v2553_v48 = vmax.f32 %v2521_v54, 0.0  ;;  %v1648_v57 = vadd.f32 %v7481_v6, %v1533_v63  ;;  %6072 = vmatmul.mubr.msk.bf16.gmra.mrb[56].mxu1 %vm807_vm0, %v6907_v30  ;;  %v1679_v26 = vmax.f32 %v1647_v16, 0.0 }
 0x1cf   : > { %v1682_v58 = vmax.f32 %v1650_v41, 0.0  ;;  %v2551_v38 = vmax.f32 %v2519_v62, 0.0  ;;  %5940 = vmatmul.mubr.msk.bf16.gmra.mrb[60].mxu0 %vm807_vm0, %v719_v7  ;;  %6075 = vmatprep.mubr.msk.bf16.mxu1 %vm807_vm0, %v7210_v18 }
 0x1d0   : > { %v2577_v40 = vpack.c.bf16 %v2553_v48, %v2552_v25  ;;  %v1680_v60 = vmax.f32 %v1648_v57, 0.0  ;;  %5945 = vmatprep.mubr.msk.bf16.mxu0 %vm807_vm0, %v6554_v50  ;;  %v6555_v48 = vld [vmem:[%s6660_s6 + $0x10] sm:$0xff]  }
 0x1d1   : > { %v7596_v52 = vpack.c.bf16 %v1682_v58, %v1681_v9  ;;  %v2576_v27 = vpack.c.bf16 %v2551_v38, %v2550_v22  ;;  %v5827_v10 = vpop.f32.mrb[16].mxu1  ;;  %v6556_v58 = vld [vmem:[%s6660_s6 + $0x18] sm:$0xff]  }
 0x1d2   : > { %v7598_v30 = vpack.c.bf16 %v1680_v60, %v1679_v26  ;;  %v2524_v13 = vadd.f32 %v5827_v10, %v7481_v6  ;;  %2616 = vrot.lane.b32.xlu1 %v2577_v40, %s6593_s26  ;;  %v5695_v19 = vpop.f32.mrb[20].mxu0  ;;  %v2411_v39 = vpop.f32.mrb[17].mxu1 }
 0x1d3   : > { %v1653_v14 = vadd.f32 %v5695_v19, %v7481_v6  ;;  %v2522_v47 = vadd.f32 %v7481_v6, %v2411_v39  ;;  %2614 = vrot.lane.b32.xlu0 %v2576_v27, %s6593_s26  ;;  %v1546_v23 = vpop.f32.mrb[21].mxu0  ;;  %v5828_v51 = vpop.f32.mrb[18].mxu1 }
 0x1d4   : > { %v1651_v35 = vadd.f32 %v7481_v6, %v1546_v23  ;;  %v2525_v53 = vadd.f32 %v5828_v51, %v7481_v6  ;;  %v5696_v56 = vpop.f32.mrb[22].mxu0  ;;  %v2414_v46 = vpop.f32.mrb[19].mxu1  ;;  %v2556_v42 = vmax.f32 %v2524_v13, 0.0 }
 0x1d5   : > { %v1654_v28 = vadd.f32 %v5696_v56, %v7481_v6  ;;  %v2523_v16 = vadd.f32 %v7481_v6, %v2414_v46  ;;  %v1549_v54 = vpop.f32.mrb[23].mxu0  ;;  %v1685_v41 = vmax.f32 %v1653_v14, 0.0  ;;  %v2554_v62 = vmax.f32 %v2522_v47, 0.0 }
 0x1d6   : > { %v2557_v3 = vmax.f32 %v2525_v53, 0.0  ;;  %v1652_v7 = vadd.f32 %v7481_v6, %v1549_v54  ;;  %6076 = vmatmul.mubr.msk.bf16.gmra.mrb[60].mxu1 %vm807_vm0, %v7531_v12  ;;  %v1683_v57 = vmax.f32 %v1651_v35, 0.0 }
 0x1d7   : > { %v1686_v63 = vmax.f32 %v1654_v28, 0.0  ;;  %v2555_v25 = vmax.f32 %v2523_v16, 0.0  ;;  %5946 = vmatmul.mubr.msk.bf16.vlgmr.msra.gmra.mrb[32].mxu0 %vm807_vm0, %v6555_v48  ;;  %6081 = vmatprep.mubr.msk.bf16.mxu1 %vm807_vm0, %v6735_v36  ;;  %v6558_v48 = vld [vmem:[%s6660_s6 + $0x28] sm:$0xff]  }
 0x1d8   : > { %v2579_v9 = vpack.c.bf16 %v2557_v3, %v2556_v42  ;;  %v1684_v22 = vmax.f32 %v1652_v7, 0.0  ;;  %5949 = vmatprep.mubr.msk.bf16.mxu0 %vm807_vm0, %v6556_v58 }
 0x1d9   : > { %v7618_v38 = vpack.c.bf16 %v1686_v63, %v1685_v41  ;;  %v2578_v26 = vpack.c.bf16 %v2555_v25, %v2554_v62  ;;  %v5831_v40 = vpop.f32.mrb[20].mxu1  ;;  %v6557_v41 = vld [vmem:[%s6660_s6 + $0x20] sm:$0xff]  }
 0x1da   : > { %v7620_v60 = vpack.c.bf16 %v1684_v22, %v1683_v57  ;;  %v2528_v50 = vadd.f32 %v5831_v40, %v7481_v6  ;;  %2620 = vrot.lane.b32.xlu1 %v2579_v9, %s6593_s26  ;;  %v5699_v27 = vpop.f32.mrb[24].mxu0  ;;  %v2427_v10 = vpop.f32.mrb[21].mxu1 }
 0x1db   : > { %v1657_v36 = vadd.f32 %v5699_v27, %v7481_v6  ;;  %v2526_v13 = vadd.f32 %v7481_v6, %v2427_v10  ;;  %2618 = vrot.lane.b32.xlu0 %v2578_v26, %s6593_s26  ;;  %v1562_v19 = vpop.f32.mrb[25].mxu0  ;;  %v5832_v39 = vpop.f32.mrb[22].mxu1 }
 0x1dc   : > { %v1655_v14 = vadd.f32 %v7481_v6, %v1562_v19  ;;  %v2529_v47 = vadd.f32 %v5832_v39, %v7481_v6  ;;  %v5700_v23 = vpop.f32.mrb[26].mxu0  ;;  %v2430_v51 = vpop.f32.mrb[23].mxu1  ;;  %v2560_v46 = vmax.f32 %v2528_v50, 0.0 }
 0x1dd   : > { %v1658_v35 = vadd.f32 %v5700_v23, %v7481_v6  ;;  %v2527_v53 = vadd.f32 %v7481_v6, %v2430_v51  ;;  %v1565_v56 = vpop.f32.mrb[27].mxu0  ;;  %v1689_v54 = vmax.f32 %v1657_v36, 0.0  ;;  %v2558_v42 = vmax.f32 %v2526_v13, 0.0 }
 0x1de   : > { %v2561_v28 = vmax.f32 %v2529_v47, 0.0  ;;  %v1656_v16 = vadd.f32 %v7481_v6, %v1565_v56  ;;  %6082 = vmatmul.mubr.msk.bf16.vlgmr.msra.gmra.mrb[32].mxu1 %vm807_vm0, %v6757_v43  ;;  %v1687_v62 = vmax.f32 %v1655_v14, 0.0 }
 0x1df   : > { %v1690_v3 = vmax.f32 %v1658_v35, 0.0  ;;  %v2559_v7 = vmax.f32 %v2527_v53, 0.0  ;;  %5950 = vmatmul.mubr.msk.bf16.gmra.mrb[36].mxu0 %vm807_vm0, %v6557_v41  ;;  %6085 = vmatprep.mubr.msk.bf16.mxu1 %vm807_vm0, %v6763_v45  ;;  %v6560_v41 = vld [vmem:[%s6660_s6 + $0x38] sm:$0xff]  }
 0x1e0   : > { %v2581_v63 = vpack.c.bf16 %v2561_v28, %v2560_v46  ;;  %v1688_v25 = vmax.f32 %v1656_v16, 0.0  ;;  %5953 = vmatprep.mubr.msk.bf16.mxu0 %vm807_vm0, %v6558_v48 }
 0x1e1   : > { %v7640_v57 = vpack.c.bf16 %v1690_v3, %v1689_v54  ;;  %v2580_v9 = vpack.c.bf16 %v2559_v7, %v2558_v42  ;;  %v5835_v43 = vpop.f32.mrb[24].mxu1  ;;  %v6559_v54 = vld [vmem:[%s6660_s6 + $0x30] sm:$0xff]  }
 0x1e2   : > { %v7642_v22 = vpack.c.bf16 %v1688_v25, %v1687_v62  ;;  %v2532_v58 = vadd.f32 %v5835_v43, %v7481_v6  ;;  %2624 = vrot.lane.b32.xlu1 %v2581_v63, %s6593_s26  ;;  %v5703_v26 = vpop.f32.mrb[28].mxu0  ;;  %v2443_v40 = vpop.f32.mrb[25].mxu1 }
 0x1e3   : > { %v1661_v45 = vadd.f32 %v5703_v26, %v7481_v6  ;;  %v2530_v50 = vadd.f32 %v7481_v6, %v2443_v40  ;;  %2622 = vrot.lane.b32.xlu0 %v2580_v9, %s6593_s26  ;;  %v1578_v27 = vpop.f32.mrb[29].mxu0  ;;  %v5836_v10 = vpop.f32.mrb[26].mxu1 }
 0x1e4   : > { %v1659_v36 = vadd.f32 %v7481_v6, %v1578_v27  ;;  %v2533_v13 = vadd.f32 %v5836_v10, %v7481_v6  ;;  %v5704_v19 = vpop.f32.mrb[30].mxu0  ;;  %v2446_v39 = vpop.f32.mrb[27].mxu1  ;;  %v2564_v51 = vmax.f32 %v2532_v58, 0.0 }
 0x1e5   : > { %v1662_v14 = vadd.f32 %v5704_v19, %v7481_v6  ;;  %v2531_v47 = vadd.f32 %v7481_v6, %v2446_v39  ;;  %v1581_v23 = vpop.f32.mrb[31].mxu0  ;;  %v1693_v56 = vmax.f32 %v1661_v45, 0.0  ;;  %v2562_v46 = vmax.f32 %v2530_v50, 0.0  ;;  %v6562_v19 = vld [vmem:[%s6660_s6 + $0x48] sm:$0xff]  }
 0x1e6   : > { %v2565_v35 = vmax.f32 %v2533_v13, 0.0  ;;  %v1660_v53 = vadd.f32 %v7481_v6, %v1581_v23  ;;  %6086 = vmatmul.mubr.msk.bf16.gmra.mrb[36].mxu1 %vm807_vm0, %v6795_v55  ;;  %v1691_v42 = vmax.f32 %v1659_v36, 0.0  ;;  %v6561_v36 = vld [vmem:[%s6660_s6 + $0x40] sm:$0xff]  }
 0x1e7   : > { %v1694_v28 = vmax.f32 %v1662_v14, 0.0  ;;  %v2563_v16 = vmax.f32 %v2531_v47, 0.0  ;;  %5954 = vmatmul.mubr.msk.bf16.gmra.mrb[40].mxu0 %vm807_vm0, %v6559_v54  ;;  %6089 = vmatprep.mubr.msk.bf16.mxu1 %vm807_vm0, %v6808_v59  ;;  %v6565_v14 = vld [vmem:[%s6660_s6 + $0x60] sm:$0xff]  }
 0x1e8   : > { %v2583_v3 = vpack.c.bf16 %v2565_v35, %v2564_v51  ;;  %v1692_v7 = vmax.f32 %v1660_v53, 0.0  ;;  %5957 = vmatprep.mubr.msk.bf16.mxu0 %vm807_vm0, %v6560_v41 }
 0x1e9   : > { %v7662_v62 = vpack.c.bf16 %v1694_v28, %v1693_v56  ;;  %v2582_v63 = vpack.c.bf16 %v2563_v16, %v2562_v46  ;;  %v5839_v55 = vpop.f32.mrb[28].mxu1 }
 0x1ea   : > { %v7664_v25 = vpack.c.bf16 %v1692_v7, %v1691_v42  ;;  %v2536_v48 = vadd.f32 %v5839_v55, %v7481_v6  ;;  %2628 = vrot.lane.b32.xlu1 %v2583_v3, %s6593_s26  ;;  %v2459_v9 = vpop.f32.mrb[29].mxu1 }
 0x1eb   : > { %v2534_v59 = vadd.f32 %v7481_v6, %v2459_v9  ;;  %2626 = vrot.lane.b32.xlu0 %v2582_v63, %s6593_s26  ;;  %v5840_v43 = vpop.f32.mrb[30].mxu1 }
 0x1ec   : > { %v2537_v58 = vadd.f32 %v5840_v43, %v7481_v6  ;;  %v2462_v26 = vpop.f32.mrb[31].mxu1  ;;  %v2568_v45 = vmax.f32 %v2536_v48, 0.0 }
 0x1ed   : > { %v2535_v40 = vadd.f32 %v7481_v6, %v2462_v26  ;;  %v2566_v27 = vmax.f32 %v2534_v59, 0.0 }
 0x1ee   : > { %v2569_v50 = vmax.f32 %v2537_v58, 0.0  ;;  %6090 = vmatmul.mubr.msk.bf16.gmra.mrb[40].mxu1 %vm807_vm0, %v6840_v8  ;;  %v6563_v8 = vld [vmem:[%s6660_s6 + $0x50] sm:$0xff]  }
 0x1ef   : > { %v2567_v10 = vmax.f32 %v2535_v40, 0.0  ;;  %5958 = vmatmul.mubr.msk.bf16.gmra.mrb[44].mxu0 %vm807_vm0, %v6561_v36  ;;  %6093 = vmatprep.mubr.msk.bf16.mxu1 %vm807_vm0, %v6847_v20  ;;  %v6564_v20 = vld [vmem:[%s6660_s6 + $0x58] sm:$0xff]  }
 0x1f0   : > { %v2585_v13 = vpack.c.bf16 %v2569_v50, %v2568_v45  ;;  %5961 = vmatprep.mubr.msk.bf16.mxu0 %vm807_vm0, %v6562_v19 }
 0x1f1   : > { %v2584_v39 = vpack.c.bf16 %v2567_v10, %v2566_v27 }
 0x1f2   : > { %2632 = vrot.lane.b32.xlu1 %v2585_v13, %s6593_s26 }
 0x1f3   : > { %2630 = vrot.lane.b32.xlu0 %v2584_v39, %s6593_s26 }
 0x1f6   : > { %6094 = vmatmul.mubr.msk.bf16.gmra.mrb[44].mxu1 %vm807_vm0, %v6867_v32  ;;  %v6566_v32 = vld [vmem:[%s6660_s6 + $0x68] sm:$0xff]  }
 0x1f7   : > { %5962 = vmatmul.mubr.msk.bf16.gmra.mrb[48].mxu0 %vm807_vm0, %v6563_v8  ;;  %6097 = vmatprep.mubr.msk.bf16.mxu1 %vm807_vm0, %v6877_v44  ;;  %v6567_v44 = vld [vmem:[%s6660_s6 + $0x70] sm:$0xff]   ;;  %s5295_s6 = sshll.u32 %s8074_s18, 8 }
 0x1f8   : > { %5965 = vmatprep.mubr.msk.bf16.mxu0 %vm807_vm0, %v6564_v20  ;;  %s7723_s30 = scalar_lea.vmem %s8048_s5, %s5295_s6 }
 0x1fe   : > { %6098 = vmatmul.mubr.msk.bf16.gmra.mrb[48].mxu1 %vm807_vm0, %v6901_v4  ;;  %v754_v4 = vrot.slane %v678_v2, 1 }
 0x1ff   : > { %5966 = vmatmul.mubr.msk.bf16.gmra.mrb[52].mxu0 %vm807_vm0, %v6565_v14  ;;  %6101 = vmatprep.mubr.msk.bf16.mxu1 %vm807_vm0, %v6911_v37 }
 0x200   : > { %5969 = vmatprep.mubr.msk.bf16.mxu0 %vm807_vm0, %v6566_v32  ;;  %v755_v37 = vor.u32 %v754_v4, %v675_v5 }
 0x206   : > { %6102 = vmatmul.mubr.msk.bf16.gmra.mrb[52].mxu1 %vm807_vm0, %v6939_v24  ;;  %v794_v24 = vsel %vm6698_vm3, %v755_v37, 0 }
 0x207   : > { %5970 = vmatmul.mubr.msk.bf16.gmra.mrb[56].mxu0 %vm807_vm0, %v6567_v44  ;;  %6105 = vmatprep.mubr.msk.bf16.mxu1 %vm807_vm0, %v6948_v49 }
 0x208   : > { %5973 = vmatprep.mubr.msk.bf16.mxu0 %vm807_vm0, %v7210_v18 }
 0x20e   : > { %6106 = vmatmul.mubr.msk.bf16.gmra.mrb[56].mxu1 %vm807_vm0, %v6969_v0 }
 0x20f   : > { %5974 = vmatmul.mubr.msk.bf16.gmra.mrb[60].mxu0 %vm807_vm0, %v7531_v12  ;;  %6109 = vmatprep.mubr.msk.bf16.mxu1 %vm807_vm0, %v7314_v1 }
 0x216   : > { %6110 = vmatmul.mubr.msk.bf16.gmra.mrb[60].mxu1 %vm807_vm0, %v794_v24 }
 0x22c   : > { %v2605_v49 = vpop.permute.xlu0 %2604 }
 0x22d   : > { %v2640_v21 = vsel %vm2634_vm7, %v7501_v17, %v2605_v49 }
 0x22e   : > { %v5043_v0 = vcombine.low %v2640_v21, %v2640_v21  ;;  %v5044_v18 = vcombine.high %v2640_v21, %v2640_v21 }
 0x230   : > { %2798 = vst.msk [vmem:[%s7723_s30 + $0x10] sm:$0xf] %vm2795_vm8, %v5043_v0  ;;  %2799 = vst.msk [vmem:[%s7723_s30 + $0x14] sm:$0xf] %vm2795_vm8, %v5044_v18  ;;  %v2603_v1 = vpop.permute.xlu0 %2602 }
 0x231   : > { %v2637_v12 = vsel %vm2634_vm7, %v7503_v29, %v2603_v1 }
 0x232   : > { %v5041_v5 = vcombine.low %v2637_v12, %v2637_v12  ;;  %v5042_v2 = vcombine.high %v2637_v12, %v2637_v12 }
 0x234   : > { %2796 = vst.msk [vmem:[%s7723_s30] sm:$0xf] %vm2795_vm8, %v5041_v5  ;;  %2797 = vst.msk [vmem:[%s7723_s30 + $0x4] sm:$0xf] %vm2795_vm8, %v5042_v2  ;;  %v2609_v17 = vpop.permute.xlu1 %2608 }
 0x235   : > { %v2646_v47 = vsel %vm2634_vm7, %v7521_v11, %v2609_v17 }
 0x236   : > { %v5047_v23 = vcombine.low %v2646_v47, %v2646_v47  ;;  %v5048_v51 = vcombine.high %v2646_v47, %v2646_v47 }
 0x238   : > { %2802 = vst.msk [vmem:[%s7723_s30 + $0x30] sm:$0xf] %vm2795_vm8, %v5047_v23  ;;  %2803 = vst.msk [vmem:[%s7723_s30 + $0x34] sm:$0xf] %vm2795_vm8, %v5048_v51  ;;  %v2607_v29 = vpop.permute.xlu1 %2606 }
 0x239   : > { %v2643_v35 = vsel %vm2634_vm7, %v7523_v33, %v2607_v29 }
 0x23a   : > { %v5045_v53 = vcombine.low %v2643_v35, %v2643_v35  ;;  %v5046_v56 = vcombine.high %v2643_v35, %v2643_v35 }
 0x23c   : > { %2800 = vst.msk [vmem:[%s7723_s30 + $0x20] sm:$0xf] %vm2795_vm8, %v5045_v53  ;;  %2801 = vst.msk [vmem:[%s7723_s30 + $0x24] sm:$0xf] %vm2795_vm8, %v5046_v56  ;;  %v2613_v11 = vpop.permute.xlu1 %2612 }
 0x23d   : > { %v2652_v46 = vsel %vm2634_vm7, %v7546_v15, %v2613_v11  ;;  %v2611_v28 = vpop.permute.xlu0 %2610 }
 0x23e   : > { %v5051_v16 = vcombine.low %v2652_v46, %v2652_v46  ;;  %v5052_v54 = vcombine.high %v2652_v46, %v2652_v46  ;;  %v2649_v42 = vsel %vm2634_vm7, %v7548_v61, %v2611_v28 }
 0x23f   : > { %v5049_v33 = vcombine.low %v2649_v42, %v2649_v42  ;;  %v5050_v3 = vcombine.high %v2649_v42, %v2649_v42 }
 0x240   : > { %2806 = vst.msk [vmem:[%s7723_s30 + $0x50] sm:$0xf] %vm2795_vm8, %v5051_v16  ;;  %2807 = vst.msk [vmem:[%s7723_s30 + $0x54] sm:$0xf] %vm2795_vm8, %v5052_v54 }
 0x241   : > { %2804 = vst.msk [vmem:[%s7723_s30 + $0x40] sm:$0xf] %vm2795_vm8, %v5049_v33  ;;  %2805 = vst.msk [vmem:[%s7723_s30 + $0x44] sm:$0xf] %vm2795_vm8, %v5050_v3 }
 0x244   : > { %v2617_v15 = vpop.permute.xlu1 %2616 }
 0x245   : > { %v2658_v7 = vsel %vm2634_vm7, %v7573_v31, %v2617_v15  ;;  %v2615_v41 = vpop.permute.xlu0 %2614 }
 0x246   : > { %v5055_v63 = vcombine.low %v2658_v7, %v2658_v7  ;;  %v5056_v61 = vcombine.high %v2658_v7, %v2658_v7  ;;  %v2655_v55 = vsel %vm2634_vm7, %v7575_v34, %v2615_v41 }
 0x247   : > { %v5053_v48 = vcombine.low %v2655_v55, %v2655_v55  ;;  %v5054_v9 = vcombine.high %v2655_v55, %v2655_v55 }
 0x248   : > { %2810 = vst.msk [vmem:[%s7723_s30 + $0x70] sm:$0xf] %vm2795_vm8, %v5055_v63  ;;  %2811 = vst.msk [vmem:[%s7723_s30 + $0x74] sm:$0xf] %vm2795_vm8, %v5056_v61 }
 0x249   : > { %2808 = vst.msk [vmem:[%s7723_s30 + $0x60] sm:$0xf] %vm2795_vm8, %v5053_v48  ;;  %2809 = vst.msk [vmem:[%s7723_s30 + $0x64] sm:$0xf] %vm2795_vm8, %v5054_v9 }
 0x24c   : > { %v2621_v31 = vpop.permute.xlu1 %2620 }
 0x24d   : > { %v2664_v59 = vsel %vm2634_vm7, %v7596_v52, %v2621_v31  ;;  %v2619_v43 = vpop.permute.xlu0 %2618 }
 0x24e   : > { %v5059_v58 = vcombine.low %v2664_v59, %v2664_v59  ;;  %v5060_v34 = vcombine.high %v2664_v59, %v2664_v59  ;;  %v2661_v26 = vsel %vm2634_vm7, %v7598_v30, %v2619_v43 }
 0x24f   : > { %v5057_v40 = vcombine.low %v2661_v26, %v2661_v26  ;;  %v5058_v45 = vcombine.high %v2661_v26, %v2661_v26 }
 0x250   : > { %2814 = vst.msk [vmem:[%s7723_s30 + $0x90] sm:$0xf] %vm2795_vm8, %v5059_v58  ;;  %2815 = vst.msk [vmem:[%s7723_s30 + $0x94] sm:$0xf] %vm2795_vm8, %v5060_v34 }
 0x251   : > { %2812 = vst.msk [vmem:[%s7723_s30 + $0x80] sm:$0xf] %vm2795_vm8, %v5057_v40  ;;  %2813 = vst.msk [vmem:[%s7723_s30 + $0x84] sm:$0xf] %vm2795_vm8, %v5058_v45 }
 0x254   : > { %v2625_v52 = vpop.permute.xlu1 %2624 }
 0x255   : > { %v2670_v50 = vsel %vm2634_vm7, %v7618_v38, %v2625_v52  ;;  %v2623_v27 = vpop.permute.xlu0 %2622 }
 0x256   : > { %v5063_v10 = vcombine.low %v2670_v50, %v2670_v50  ;;  %v5064_v30 = vcombine.high %v2670_v50, %v2670_v50  ;;  %v2667_v36 = vsel %vm2634_vm7, %v7620_v60, %v2623_v27 }
 0x257   : > { %v5061_v13 = vcombine.low %v2667_v36, %v2667_v36  ;;  %v5062_v19 = vcombine.high %v2667_v36, %v2667_v36 }
 0x258   : > { %2818 = vst.msk [vmem:[%s7723_s30 + $0xb0] sm:$0xf] %vm2795_vm8, %v5063_v10  ;;  %2819 = vst.msk [vmem:[%s7723_s30 + $0xb4] sm:$0xf] %vm2795_vm8, %v5064_v30 }
 0x259   : > { %2816 = vst.msk [vmem:[%s7723_s30 + $0xa0] sm:$0xf] %vm2795_vm8, %v5061_v13  ;;  %2817 = vst.msk [vmem:[%s7723_s30 + $0xa4] sm:$0xf] %vm2795_vm8, %v5062_v19 }
 0x25c   : > { %v2629_v38 = vpop.permute.xlu1 %2628 }
 0x25d   : > { %v2676_v39 = vsel %vm2634_vm7, %v7640_v57, %v2629_v38  ;;  %v2627_v8 = vpop.permute.xlu0 %2626 }
 0x25e   : > { %v5067_v20 = vcombine.low %v2676_v39, %v2676_v39  ;;  %v5068_v60 = vcombine.high %v2676_v39, %v2676_v39  ;;  %v2673_v14 = vsel %vm2634_vm7, %v7642_v22, %v2627_v8 }
 0x25f   : > { %v5065_v32 = vcombine.low %v2673_v14, %v2673_v14  ;;  %v5066_v44 = vcombine.high %v2673_v14, %v2673_v14 }
 0x260   : > { %2822 = vst.msk [vmem:[%s7723_s30 + $0xd0] sm:$0xf] %vm2795_vm8, %v5067_v20  ;;  %2823 = vst.msk [vmem:[%s7723_s30 + $0xd4] sm:$0xf] %vm2795_vm8, %v5068_v60 }
 0x261   : > { %2820 = vst.msk [vmem:[%s7723_s30 + $0xc0] sm:$0xf] %vm2795_vm8, %v5065_v32  ;;  %2821 = vst.msk [vmem:[%s7723_s30 + $0xc4] sm:$0xf] %vm2795_vm8, %v5066_v44 }
 0x264   : > { %v2633_v57 = vpop.permute.xlu1 %2632 }
 0x265   : > { %v2682_v4 = vsel %vm2634_vm7, %v7662_v62, %v2633_v57  ;;  %v2631_v37 = vpop.permute.xlu0 %2630 }
 0x266   : > { %v5071_v24 = vcombine.low %v2682_v4, %v2682_v4  ;;  %v5072_v22 = vcombine.high %v2682_v4, %v2682_v4  ;;  %v2679_v49 = vsel %vm2634_vm7, %v7664_v25, %v2631_v37 }
 0x267   : > { %v5069_v21 = vcombine.low %v2679_v49, %v2679_v49  ;;  %v5070_v0 = vcombine.high %v2679_v49, %v2679_v49 }
 0x268   : > { %2826 = vst.msk [vmem:[%s7723_s30 + $0xf0] sm:$0xf] %vm2795_vm8, %v5071_v24  ;;  %2827 = vst.msk [vmem:[%s7723_s30 + $0xf4] sm:$0xf] %vm2795_vm8, %v5072_v22 }
 0x269   : > { %2824 = vst.msk [vmem:[%s7723_s30 + $0xe0] sm:$0xf] %vm2795_vm8, %v5069_v21  ;;  %2825 = vst.msk [vmem:[%s7723_s30 + $0xe4] sm:$0xf] %vm2795_vm8, %v5070_v0 }
 0x2aa   : > { %v5947_v18 = vpop.f32.mrb[32].mxu0 }
 0x2ab   : > { %v3579_v1 = vadd.f32 %v5947_v18, %v7481_v6  ;;  %v3418_v62 = vpop.f32.mrb[33].mxu0 }
 0x2ac   : > { %v3577_v12 = vadd.f32 %v7481_v6, %v3418_v62  ;;  %v5948_v5 = vpop.f32.mrb[34].mxu0 }
 0x2ad   : > { %v3580_v2 = vadd.f32 %v5948_v5, %v7481_v6  ;;  %v3421_v25 = vpop.f32.mrb[35].mxu0  ;;  %v3611_v47 = vmax.f32 %v3579_v1, 0.0 }
 0x2ae   : > { %v3578_v17 = vadd.f32 %v7481_v6, %v3421_v25  ;;  %v3609_v51 = vmax.f32 %v3577_v12, 0.0 }
 0x2af   : > { %v3612_v23 = vmax.f32 %v3580_v2, 0.0 }
 0x2b0   : > { %v3610_v29 = vmax.f32 %v3578_v17, 0.0 }
 0x2b1   : > { %v7825_v35 = vpack.c.bf16 %v3612_v23, %v3611_v47  ;;  %v6083_v53 = vpop.f32.mrb[32].mxu1 }
 0x2b2   : > { %v7827_v56 = vpack.c.bf16 %v3610_v29, %v3609_v51  ;;  %v4406_v11 = vadd.f32 %v6083_v53, %v7481_v6  ;;  %v5951_v46 = vpop.f32.mrb[36].mxu0  ;;  %v4245_v28 = vpop.f32.mrb[33].mxu1 }
 0x2b3   : > { %v3583_v16 = vadd.f32 %v5951_v46, %v7481_v6  ;;  %v4404_v54 = vadd.f32 %v7481_v6, %v4245_v28  ;;  %v3434_v42 = vpop.f32.mrb[37].mxu0  ;;  %v6084_v33 = vpop.f32.mrb[34].mxu1 }
 0x2b4   : > { %v3581_v3 = vadd.f32 %v7481_v6, %v3434_v42  ;;  %v4407_v15 = vadd.f32 %v6084_v33, %v7481_v6  ;;  %v5952_v7 = vpop.f32.mrb[38].mxu0  ;;  %v4248_v41 = vpop.f32.mrb[35].mxu1  ;;  %v4438_v48 = vmax.f32 %v4406_v11, 0.0 }
 0x2b5   : > { %v3584_v63 = vadd.f32 %v5952_v7, %v7481_v6  ;;  %v4405_v61 = vadd.f32 %v7481_v6, %v4248_v41  ;;  %v3437_v55 = vpop.f32.mrb[39].mxu0  ;;  %v3615_v59 = vmax.f32 %v3583_v16, 0.0  ;;  %v4436_v43 = vmax.f32 %v4404_v54, 0.0 }
 0x2b6   : > { %v4439_v9 = vmax.f32 %v4407_v15, 0.0  ;;  %v3582_v31 = vadd.f32 %v7481_v6, %v3437_v55  ;;  %v3613_v26 = vmax.f32 %v3581_v3, 0.0 }
 0x2b7   : > { %v3616_v58 = vmax.f32 %v3584_v63, 0.0  ;;  %v4437_v34 = vmax.f32 %v4405_v61, 0.0 }
 0x2b8   : > { %v4469_v40 = vpack.c.bf16 %v4439_v9, %v4438_v48  ;;  %v3614_v45 = vmax.f32 %v3582_v31, 0.0 }
 0x2b9   : > { %v7837_v52 = vpack.c.bf16 %v3616_v58, %v3615_v59  ;;  %v4468_v50 = vpack.c.bf16 %v4437_v34, %v4436_v43  ;;  %v6087_v27 = vpop.f32.mrb[36].mxu1 }
 0x2ba   : > { %v7839_v10 = vpack.c.bf16 %v3614_v45, %v3613_v26  ;;  %v4410_v30 = vadd.f32 %v6087_v27, %v7481_v6  ;;  %4502 = vrot.lane.b32.xlu1 %v4469_v40, %s6593_s26  ;;  %v5955_v36 = vpop.f32.mrb[40].mxu0  ;;  %v4261_v13 = vpop.f32.mrb[37].mxu1  ;;  %v7872_v45 = vld [vmem:[%s8047_s4] ss:$0 sm:$0xff] }
 0x2bb   : > { %v3587_v19 = vadd.f32 %v5955_v36, %v7481_v6  ;;  %v4408_v38 = vadd.f32 %v7481_v6, %v4261_v13  ;;  %v6088_v39 = vpop.f32.mrb[38].mxu1  ;;  %4500 = vrot.lane.b32.xlu0 %v4468_v50, %s6593_s26  ;;  %v3450_v8 = vpop.f32.mrb[41].mxu0 }
 0x2bc   : > { %v4411_v20 = vadd.f32 %v6088_v39, %v7481_v6  ;;  %v3585_v60 = vadd.f32 %v7481_v6, %v3450_v8  ;;  %v5956_v14 = vpop.f32.mrb[42].mxu0  ;;  %v4264_v32 = vpop.f32.mrb[39].mxu1  ;;  %v4442_v37 = vmax.f32 %v4410_v30, 0.0 }
 0x2bd   : > { %v3588_v44 = vadd.f32 %v5956_v14, %v7481_v6  ;;  %v4409_v57 = vadd.f32 %v7481_v6, %v4264_v32  ;;  %v3453_v4 = vpop.f32.mrb[43].mxu0  ;;  %v3619_v49 = vmax.f32 %v3587_v19, 0.0  ;;  %v4440_v21 = vmax.f32 %v4408_v38, 0.0 }
 0x2be   : > { %v4443_v24 = vmax.f32 %v4411_v20, 0.0  ;;  %v3586_v22 = vadd.f32 %v7481_v6, %v3453_v4  ;;  %v3617_v62 = vmax.f32 %v3585_v60, 0.0 }
 0x2bf   : > { %v3620_v0 = vmax.f32 %v3588_v44, 0.0  ;;  %v4441_v18 = vmax.f32 %v4409_v57, 0.0 }
 0x2c0   : > { %v4471_v1 = vpack.c.bf16 %v4443_v24, %v4442_v37  ;;  %v3618_v12 = vmax.f32 %v3586_v22, 0.0 }
 0x2c1   : > { %v7851_v5 = vpack.c.bf16 %v3620_v0, %v3619_v49  ;;  %v4470_v2 = vpack.c.bf16 %v4441_v18, %v4440_v21  ;;  %v6091_v25 = vpop.f32.mrb[40].mxu1 }
 0x2c2   : > { %v7853_v17 = vpack.c.bf16 %v3618_v12, %v3617_v62  ;;  %v4414_v47 = vadd.f32 %v6091_v25, %v7481_v6  ;;  %4506 = vrot.lane.b32.xlu1 %v4471_v1, %s6593_s26  ;;  %v5959_v23 = vpop.f32.mrb[44].mxu0  ;;  %v4277_v51 = vpop.f32.mrb[41].mxu1 }
 0x2c3   : > { %v3591_v29 = vadd.f32 %v5959_v23, %v7481_v6  ;;  %v4412_v53 = vadd.f32 %v7481_v6, %v4277_v51  ;;  %v6092_v11 = vpop.f32.mrb[42].mxu1  ;;  %4504 = vrot.lane.b32.xlu0 %v4470_v2, %s6593_s26  ;;  %v3466_v46 = vpop.f32.mrb[45].mxu0 }
 0x2c4   : > { %v4415_v28 = vadd.f32 %v6092_v11, %v7481_v6  ;;  %v3589_v16 = vadd.f32 %v7481_v6, %v3466_v46  ;;  %v5960_v54 = vpop.f32.mrb[46].mxu0  ;;  %v4280_v42 = vpop.f32.mrb[43].mxu1  ;;  %v4446_v7 = vmax.f32 %v4414_v47, 0.0 }
 0x2c5   : > { %v3592_v33 = vadd.f32 %v5960_v54, %v7481_v6  ;;  %v4413_v3 = vadd.f32 %v7481_v6, %v4280_v42  ;;  %v3469_v15 = vpop.f32.mrb[47].mxu0  ;;  %v3623_v61 = vmax.f32 %v3591_v29, 0.0  ;;  %v4444_v55 = vmax.f32 %v4412_v53, 0.0 }
 0x2c6   : > { %v4447_v41 = vmax.f32 %v4415_v28, 0.0  ;;  %v3590_v63 = vadd.f32 %v7481_v6, %v3469_v15  ;;  %v3621_v59 = vmax.f32 %v3589_v16, 0.0 }
 0x2c7   : > { %v3624_v48 = vmax.f32 %v3592_v33, 0.0  ;;  %v4445_v9 = vmax.f32 %v4413_v3, 0.0 }
 0x2c8   : > { %v4473_v31 = vpack.c.bf16 %v4447_v41, %v4446_v7  ;;  %v3622_v43 = vmax.f32 %v3590_v63, 0.0 }
 0x2c9   : > { %v7865_v58 = vpack.c.bf16 %v3624_v48, %v3623_v61  ;;  %v4472_v34 = vpack.c.bf16 %v4445_v9, %v4444_v55  ;;  %v6095_v26 = vpop.f32.mrb[44].mxu1 }
 0x2ca   : > { %v7867_v40 = vpack.c.bf16 %v3622_v43, %v3621_v59  ;;  %v4418_v6 = vadd.f32 %v7872_v45, %v6095_v26  ;;  %4510 = vrot.lane.b32.xlu1 %v4473_v31, %s6593_s26  ;;  %v5963_v50 = vpop.f32.mrb[48].mxu0  ;;  %v4293_v27 = vpop.f32.mrb[45].mxu1 }
 0x2cb   : > { %v3595_v30 = vadd.f32 %v7872_v45, %v5963_v50  ;;  %v4416_v36 = vadd.f32 %v7872_v45, %v4293_v27  ;;  %v6096_v13 = vpop.f32.mrb[46].mxu1  ;;  %4508 = vrot.lane.b32.xlu0 %v4472_v34, %s6593_s26  ;;  %v3482_v19 = vpop.f32.mrb[49].mxu0 }
 0x2cc   : > { %v4419_v38 = vadd.f32 %v7872_v45, %v6096_v13  ;;  %v3593_v39 = vadd.f32 %v7872_v45, %v3482_v19  ;;  %v5964_v8 = vpop.f32.mrb[50].mxu0  ;;  %v4296_v20 = vpop.f32.mrb[47].mxu1  ;;  %v4450_v44 = vmax.f32 %v4418_v6, 0.0 }
 0x2cd   : > { %v3596_v60 = vadd.f32 %v7872_v45, %v5964_v8  ;;  %v4417_v14 = vadd.f32 %v7872_v45, %v4296_v20  ;;  %v3485_v32 = vpop.f32.mrb[51].mxu0  ;;  %v3627_v37 = vmax.f32 %v3595_v30, 0.0  ;;  %v4448_v24 = vmax.f32 %v4416_v36, 0.0 }
 0x2ce   : > { %v4451_v57 = vmax.f32 %v4419_v38, 0.0  ;;  %v3594_v4 = vadd.f32 %v7872_v45, %v3485_v32  ;;  %v3625_v0 = vmax.f32 %v3593_v39, 0.0 }
 0x2cf   : > { %v3628_v22 = vmax.f32 %v3596_v60, 0.0  ;;  %v4449_v49 = vmax.f32 %v4417_v14, 0.0 }
 0x2d0   : > { %v4475_v21 = vpack.c.bf16 %v4451_v57, %v4450_v44  ;;  %v3626_v18 = vmax.f32 %v3594_v4, 0.0 }
 0x2d1   : > { %v7884_v1 = vpack.c.bf16 %v3628_v22, %v3627_v37  ;;  %v4474_v62 = vpack.c.bf16 %v4449_v49, %v4448_v24  ;;  %v6099_v12 = vpop.f32.mrb[48].mxu1 }
 0x2d2   : > { %v7886_v2 = vpack.c.bf16 %v3626_v18, %v3625_v0  ;;  %v4422_v25 = vadd.f32 %v7872_v45, %v6099_v12  ;;  %4514 = vrot.lane.b32.xlu1 %v4475_v21, %s6593_s26  ;;  %v5967_v47 = vpop.f32.mrb[52].mxu0  ;;  %v4309_v23 = vpop.f32.mrb[49].mxu1 }
 0x2d3   : > { %v3599_v51 = vadd.f32 %v7872_v45, %v5967_v47  ;;  %v4420_v29 = vadd.f32 %v7872_v45, %v4309_v23  ;;  %v6100_v53 = vpop.f32.mrb[50].mxu1  ;;  %4512 = vrot.lane.b32.xlu0 %v4474_v62, %s6593_s26  ;;  %v3498_v11 = vpop.f32.mrb[53].mxu0 }
 0x2d4   : > { %v4423_v46 = vadd.f32 %v7872_v45, %v6100_v53  ;;  %v3597_v28 = vadd.f32 %v7872_v45, %v3498_v11  ;;  %v5968_v16 = vpop.f32.mrb[54].mxu0  ;;  %v4312_v54 = vpop.f32.mrb[51].mxu1  ;;  %v4454_v15 = vmax.f32 %v4422_v25, 0.0 }
 0x2d5   : > { %v3600_v42 = vadd.f32 %v7872_v45, %v5968_v16  ;;  %v4421_v33 = vadd.f32 %v7872_v45, %v4312_v54  ;;  %v3501_v3 = vpop.f32.mrb[55].mxu0  ;;  %v3631_v63 = vmax.f32 %v3599_v51, 0.0  ;;  %v4452_v61 = vmax.f32 %v4420_v29, 0.0 }
 0x2d6   : > { %v4455_v7 = vmax.f32 %v4423_v46, 0.0  ;;  %v3598_v41 = vadd.f32 %v7872_v45, %v3501_v3  ;;  %v3629_v31 = vmax.f32 %v3597_v28, 0.0 }
 0x2d7   : > { %v3632_v55 = vmax.f32 %v3600_v42, 0.0  ;;  %v4453_v48 = vmax.f32 %v4421_v33, 0.0 }
 0x2d8   : > { %v4477_v9 = vpack.c.bf16 %v4455_v7, %v4454_v15  ;;  %v3630_v59 = vmax.f32 %v3598_v41, 0.0 }
 0x2d9   : > { %v7898_v43 = vpack.c.bf16 %v3632_v55, %v3631_v63  ;;  %v4476_v34 = vpack.c.bf16 %v4453_v48, %v4452_v61  ;;  %v6103_v26 = vpop.f32.mrb[52].mxu1 }
 0x2da   : > { %v7900_v6 = vpack.c.bf16 %v3630_v59, %v3629_v31  ;;  %v4426_v50 = vadd.f32 %v7872_v45, %v6103_v26  ;;  %4518 = vrot.lane.b32.xlu1 %v4477_v9, %s6593_s26  ;;  %v5971_v27 = vpop.f32.mrb[56].mxu0  ;;  %v4325_v30 = vpop.f32.mrb[53].mxu1 }
 0x2db   : > { %v3603_v36 = vadd.f32 %v7872_v45, %v5971_v27  ;;  %v4424_v13 = vadd.f32 %v7872_v45, %v4325_v30  ;;  %v6104_v19 = vpop.f32.mrb[54].mxu1  ;;  %4516 = vrot.lane.b32.xlu0 %v4476_v34, %s6593_s26  ;;  %v3514_v38 = vpop.f32.mrb[57].mxu0 }
 0x2dc   : > { %v4427_v39 = vadd.f32 %v7872_v45, %v6104_v19  ;;  %v3601_v8 = vadd.f32 %v7872_v45, %v3514_v38  ;;  %v5972_v20 = vpop.f32.mrb[58].mxu0  ;;  %v4328_v60 = vpop.f32.mrb[55].mxu1  ;;  %v4458_v57 = vmax.f32 %v4426_v50, 0.0 }
 0x2dd   : > { %v3604_v14 = vadd.f32 %v7872_v45, %v5972_v20  ;;  %v4425_v32 = vadd.f32 %v7872_v45, %v4328_v60  ;;  %v3517_v44 = vpop.f32.mrb[59].mxu0  ;;  %v3635_v24 = vmax.f32 %v3603_v36, 0.0  ;;  %v4456_v22 = vmax.f32 %v4424_v13, 0.0 }
 0x2de   : > { %v4459_v4 = vmax.f32 %v4427_v39, 0.0  ;;  %v3602_v37 = vadd.f32 %v7872_v45, %v3517_v44  ;;  %v3633_v18 = vmax.f32 %v3601_v8, 0.0 }
 0x2df   : > { %v3636_v49 = vmax.f32 %v3604_v14, 0.0  ;;  %v4457_v21 = vmax.f32 %v4425_v32, 0.0 }
 0x2e0   : > { %v4479_v0 = vpack.c.bf16 %v4459_v4, %v4458_v57  ;;  %v3634_v62 = vmax.f32 %v3602_v37, 0.0 }
 0x2e1   : > { %v7912_v12 = vpack.c.bf16 %v3636_v49, %v3635_v24  ;;  %v4478_v25 = vpack.c.bf16 %v4457_v21, %v4456_v22  ;;  %v6107_v47 = vpop.f32.mrb[56].mxu1 }
 0x2e2   : > { %v7914_v23 = vpack.c.bf16 %v3634_v62, %v3633_v18  ;;  %v4430_v51 = vadd.f32 %v7872_v45, %v6107_v47  ;;  %4522 = vrot.lane.b32.xlu1 %v4479_v0, %s6593_s26  ;;  %v5975_v29 = vpop.f32.mrb[60].mxu0  ;;  %v4341_v53 = vpop.f32.mrb[57].mxu1 }
 0x2e3   : > { %v3607_v11 = vadd.f32 %v7872_v45, %v5975_v29  ;;  %v4428_v46 = vadd.f32 %v7872_v45, %v4341_v53  ;;  %v6108_v28 = vpop.f32.mrb[58].mxu1  ;;  %4520 = vrot.lane.b32.xlu0 %v4478_v25, %s6593_s26  ;;  %v3530_v16 = vpop.f32.mrb[61].mxu0 }
 0x2e4   : > { %v4431_v54 = vadd.f32 %v7872_v45, %v6108_v28  ;;  %v3605_v42 = vadd.f32 %v7872_v45, %v3530_v16  ;;  %v5976_v33 = vpop.f32.mrb[62].mxu0  ;;  %v4344_v3 = vpop.f32.mrb[59].mxu1  ;;  %v4462_v63 = vmax.f32 %v4430_v51, 0.0 }
 0x2e5   : > { %v3608_v15 = vadd.f32 %v7872_v45, %v5976_v33  ;;  %v4429_v7 = vadd.f32 %v7872_v45, %v4344_v3  ;;  %v3533_v41 = vpop.f32.mrb[63].mxu0  ;;  %v3639_v48 = vmax.f32 %v3607_v11, 0.0  ;;  %v4460_v9 = vmax.f32 %v4428_v46, 0.0 }
 0x2e6   : > { %v4463_v61 = vmax.f32 %v4431_v54, 0.0  ;;  %v3606_v55 = vadd.f32 %v7872_v45, %v3533_v41  ;;  %v3637_v26 = vmax.f32 %v3605_v42, 0.0 }
 0x2e7   : > { %v3640_v31 = vmax.f32 %v3608_v15, 0.0  ;;  %v4461_v59 = vmax.f32 %v4429_v7, 0.0 }
 0x2e8   : > { %v4481_v34 = vpack.c.bf16 %v4463_v61, %v4462_v63  ;;  %v3638_v50 = vmax.f32 %v3606_v55, 0.0 }
 0x2e9   : > { %v7926_v27 = vpack.c.bf16 %v3640_v31, %v3639_v48  ;;  %v4480_v30 = vpack.c.bf16 %v4461_v59, %v4460_v9  ;;  %v6111_v36 = vpop.f32.mrb[60].mxu1 }
 0x2ea   : > { %v7928_v13 = vpack.c.bf16 %v3638_v50, %v3637_v26  ;;  %v4434_v19 = vadd.f32 %v7872_v45, %v6111_v36  ;;  %4526 = vrot.lane.b32.xlu1 %v4481_v34, %s6593_s26  ;;  %v4357_v38 = vpop.f32.mrb[61].mxu1 }
 0x2eb   : > { %v4432_v39 = vadd.f32 %v7872_v45, %v4357_v38  ;;  %v6112_v8 = vpop.f32.mrb[62].mxu1  ;;  %4524 = vrot.lane.b32.xlu0 %v4480_v30, %s6593_s26 }
 0x2ec   : > { %v4435_v20 = vadd.f32 %v7872_v45, %v6112_v8  ;;  %v4360_v60 = vpop.f32.mrb[63].mxu1  ;;  %v4466_v32 = vmax.f32 %v4434_v19, 0.0 }
 0x2ed   : > { %v4433_v14 = vadd.f32 %v7872_v45, %v4360_v60  ;;  %v4464_v57 = vmax.f32 %v4432_v39, 0.0 }
 0x2ee   : > { %v4467_v44 = vmax.f32 %v4435_v20, 0.0 }
 0x2ef   : > { %v4465_v4 = vmax.f32 %v4433_v14, 0.0 }
 0x2f0   : > { %v4483_v37 = vpack.c.bf16 %v4467_v44, %v4466_v32 }
 0x2f1   : > { %v4482_v24 = vpack.c.bf16 %v4465_v4, %v4464_v57 }
 0x2f2   : > { %4530 = vrot.lane.b32.xlu1 %v4483_v37, %s6593_s26 }
 0x2f3   : > { %4528 = vrot.lane.b32.xlu0 %v4482_v24, %s6593_s26 }
 0x32c   : > { %v4503_v22 = vpop.permute.xlu1 %4502 }
 0x32d   : > { %v4537_v49 = vsel %vm2634_vm7, %v7825_v35, %v4503_v22  ;;  %v4501_v21 = vpop.permute.xlu0 %4500 }
 0x32e   : > { %v5227_v45 = vcombine.low %v4537_v49, %v4537_v49  ;;  %v5228_v0 = vcombine.high %v4537_v49, %v4537_v49  ;;  %v4534_v18 = vsel %vm2634_vm7, %v7827_v56, %v4501_v21 }
 0x32f   : > { %v5225_v62 = vcombine.low %v4534_v18, %v4534_v18  ;;  %v5226_v25 = vcombine.high %v4534_v18, %v4534_v18 }
 0x330   : > { %5259 = vst.msk [vmem:[%s7723_s30 + $0x18] sm:$0xf] %vm2795_vm8, %v5227_v45  ;;  %5260 = vst.msk [vmem:[%s7723_s30 + $0x1c] sm:$0xf] %vm2795_vm8, %v5228_v0 }
 0x331   : > { %5257 = vst.msk [vmem:[%s7723_s30 + $0x8] sm:$0xf] %vm2795_vm8, %v5225_v62  ;;  %5258 = vst.msk [vmem:[%s7723_s30 + $0xc] sm:$0xf] %vm2795_vm8, %v5226_v25 }
 0x334   : > { %v4507_v35 = vpop.permute.xlu1 %4506 }
 0x335   : > { %v4543_v47 = vsel %vm2634_vm7, %v7837_v52, %v4507_v35  ;;  %v4505_v51 = vpop.permute.xlu0 %4504 }
 0x336   : > { %v5231_v29 = vcombine.low %v4543_v47, %v4543_v47  ;;  %v5232_v56 = vcombine.high %v4543_v47, %v4543_v47  ;;  %v4540_v53 = vsel %vm2634_vm7, %v7839_v10, %v4505_v51 }
 0x337   : > { %v5229_v11 = vcombine.low %v4540_v53, %v4540_v53  ;;  %v5230_v46 = vcombine.high %v4540_v53, %v4540_v53 }
 0x338   : > { %5263 = vst.msk [vmem:[%s7723_s30 + $0x38] sm:$0xf] %vm2795_vm8, %v5231_v29  ;;  %5264 = vst.msk [vmem:[%s7723_s30 + $0x3c] sm:$0xf] %vm2795_vm8, %v5232_v56 }
 0x339   : > { %5261 = vst.msk [vmem:[%s7723_s30 + $0x28] sm:$0xf] %vm2795_vm8, %v5229_v11  ;;  %5262 = vst.msk [vmem:[%s7723_s30 + $0x2c] sm:$0xf] %vm2795_vm8, %v5230_v46 }
 0x33c   : > { %v4511_v52 = vpop.permute.xlu1 %4510 }
 0x33d   : > { %v4549_v28 = vsel %vm2634_vm7, %v7851_v5, %v4511_v52  ;;  %v4509_v16 = vpop.permute.xlu0 %4508 }
 0x33e   : > { %v5235_v54 = vcombine.low %v4549_v28, %v4549_v28  ;;  %v5236_v10 = vcombine.high %v4549_v28, %v4549_v28  ;;  %v4546_v42 = vsel %vm2634_vm7, %v7853_v17, %v4509_v16 }
 0x33f   : > { %v5233_v33 = vcombine.low %v4546_v42, %v4546_v42  ;;  %v5234_v3 = vcombine.high %v4546_v42, %v4546_v42 }
 0x340   : > { %5267 = vst.msk [vmem:[%s7723_s30 + $0x58] sm:$0xf] %vm2795_vm8, %v5235_v54  ;;  %5268 = vst.msk [vmem:[%s7723_s30 + $0x5c] sm:$0xf] %vm2795_vm8, %v5236_v10 }
 0x341   : > { %5265 = vst.msk [vmem:[%s7723_s30 + $0x48] sm:$0xf] %vm2795_vm8, %v5233_v33  ;;  %5266 = vst.msk [vmem:[%s7723_s30 + $0x4c] sm:$0xf] %vm2795_vm8, %v5234_v3 }
 0x344   : > { %v4515_v5 = vpop.permute.xlu1 %4514 }
 0x345   : > { %v4555_v15 = vsel %vm2634_vm7, %v7865_v58, %v4515_v5  ;;  %v4513_v7 = vpop.permute.xlu0 %4512 }
 0x346   : > { %v5239_v41 = vcombine.low %v4555_v15, %v4555_v15  ;;  %v5240_v17 = vcombine.high %v4555_v15, %v4555_v15  ;;  %v4552_v63 = vsel %vm2634_vm7, %v7867_v40, %v4513_v7 }
 0x347   : > { %v5237_v61 = vcombine.low %v4552_v63, %v4552_v63  ;;  %v5238_v55 = vcombine.high %v4552_v63, %v4552_v63 }
 0x348   : > { %5271 = vst.msk [vmem:[%s7723_s30 + $0x78] sm:$0xf] %vm2795_vm8, %v5239_v41  ;;  %5272 = vst.msk [vmem:[%s7723_s30 + $0x7c] sm:$0xf] %vm2795_vm8, %v5240_v17 }
 0x349   : > { %5269 = vst.msk [vmem:[%s7723_s30 + $0x68] sm:$0xf] %vm2795_vm8, %v5237_v61  ;;  %5270 = vst.msk [vmem:[%s7723_s30 + $0x6c] sm:$0xf] %vm2795_vm8, %v5238_v55 }
 0x34c   : > { %v4519_v58 = vpop.permute.xlu1 %4518 }
 0x34d   : > { %v4561_v48 = vsel %vm2634_vm7, %v7884_v1, %v4519_v58  ;;  %v4517_v9 = vpop.permute.xlu0 %4516 }
 0x34e   : > { %v5243_v31 = vcombine.low %v4561_v48, %v4561_v48  ;;  %v5244_v40 = vcombine.high %v4561_v48, %v4561_v48  ;;  %v4558_v59 = vsel %vm2634_vm7, %v7886_v2, %v4517_v9 }
 0x34f   : > { %v5241_v34 = vcombine.low %v4558_v59, %v4558_v59  ;;  %v5242_v26 = vcombine.high %v4558_v59, %v4558_v59 }
 0x350   : > { %5275 = vst.msk [vmem:[%s7723_s30 + $0x98] sm:$0xf] %vm2795_vm8, %v5243_v31  ;;  %5276 = vst.msk [vmem:[%s7723_s30 + $0x9c] sm:$0xf] %vm2795_vm8, %v5244_v40 }
 0x351   : > { %5273 = vst.msk [vmem:[%s7723_s30 + $0x88] sm:$0xf] %vm2795_vm8, %v5241_v34  ;;  %5274 = vst.msk [vmem:[%s7723_s30 + $0x8c] sm:$0xf] %vm2795_vm8, %v5242_v26 }
 0x354   : > { %v4523_v1 = vpop.permute.xlu1 %4522 }
 0x355   : > { %v4567_v50 = vsel %vm2634_vm7, %v7898_v43, %v4523_v1  ;;  %v4521_v30 = vpop.permute.xlu0 %4520 }
 0x356   : > { %v5247_v36 = vcombine.low %v4567_v50, %v4567_v50  ;;  %v5248_v2 = vcombine.high %v4567_v50, %v4567_v50  ;;  %v4564_v19 = vsel %vm2634_vm7, %v7900_v6, %v4521_v30 }
 0x357   : > { %v5245_v38 = vcombine.low %v4564_v19, %v4564_v19  ;;  %v5246_v39 = vcombine.high %v4564_v19, %v4564_v19 }
 0x358   : > { %5279 = vst.msk [vmem:[%s7723_s30 + $0xb8] sm:$0xf] %vm2795_vm8, %v5247_v36  ;;  %5280 = vst.msk [vmem:[%s7723_s30 + $0xbc] sm:$0xf] %vm2795_vm8, %v5248_v2 }
 0x359   : > { %5277 = vst.msk [vmem:[%s7723_s30 + $0xa8] sm:$0xf] %vm2795_vm8, %v5245_v38  ;;  %5278 = vst.msk [vmem:[%s7723_s30 + $0xac] sm:$0xf] %vm2795_vm8, %v5246_v39 }
 0x35c   : > { %v4527_v43 = vpop.permute.xlu1 %4526 }
 0x35d   : > { %v4573_v8 = vsel %vm2634_vm7, %v7912_v12, %v4527_v43  ;;  %v4525_v20 = vpop.permute.xlu0 %4524 }
 0x35e   : > { %v5251_v60 = vcombine.low %v4573_v8, %v4573_v8  ;;  %v5252_v6 = vcombine.high %v4573_v8, %v4573_v8  ;;  %v4570_v14 = vsel %vm2634_vm7, %v7914_v23, %v4525_v20 }
 0x35f   : > { %v5249_v32 = vcombine.low %v4570_v14, %v4570_v14  ;;  %v5250_v44 = vcombine.high %v4570_v14, %v4570_v14 }
 0x360   : > { %5283 = vst.msk [vmem:[%s7723_s30 + $0xd8] sm:$0xf] %vm2795_vm8, %v5251_v60  ;;  %5284 = vst.msk [vmem:[%s7723_s30 + $0xdc] sm:$0xf] %vm2795_vm8, %v5252_v6 }
 0x361   : > { %5281 = vst.msk [vmem:[%s7723_s30 + $0xc8] sm:$0xf] %vm2795_vm8, %v5249_v32  ;;  %5282 = vst.msk [vmem:[%s7723_s30 + $0xcc] sm:$0xf] %vm2795_vm8, %v5250_v44 }
 0x364   : > { %v4531_v12 = vpop.permute.xlu1 %4530 }
 0x365   : > { %v4579_v57 = vsel %vm2634_vm7, %v7926_v27, %v4531_v12  ;;  %v4529_v4 = vpop.permute.xlu0 %4528 }
 0x366   : > { %v5255_v37 = vcombine.low %v4579_v57, %v4579_v57  ;;  %v5256_v23 = vcombine.high %v4579_v57, %v4579_v57  ;;  %v4576_v24 = vsel %vm2634_vm7, %v7928_v13, %v4529_v4 }
 0x367   : > { %v5253_v22 = vcombine.low %v4576_v24, %v4576_v24  ;;  %v5254_v49 = vcombine.high %v4576_v24, %v4576_v24 }
 0x368   : > { %5287 = vst.msk [vmem:[%s7723_s30 + $0xf8] sm:$0xf] %vm2795_vm8, %v5255_v37  ;;  %5288 = vst.msk [vmem:[%s7723_s30 + $0xfc] sm:$0xf] %vm2795_vm8, %v5256_v23 }
 0x369   : > { %5285 = vst.msk [vmem:[%s7723_s30 + $0xe8] sm:$0xf] %vm2795_vm8, %v5253_v22  ;;  %5286 = vst.msk [vmem:[%s7723_s30 + $0xec] sm:$0xf] %vm2795_vm8, %v5254_v49 }
 0x36a PF: > { %s15_s20 = sadd.s32 1, %s6591_s20   ;;  %s8069_s18 = smov %s6587_s19 }
 0x36b   : > { %p12_p5 = scmp.ge.s32.totalorder %s15_s20, 4   ;;  %s8070_s19 = smov %s8072_s21 }
 0x36d   :  { %14 = sbr.rel (!%p12_p5) target bundleno = 2 (0x2), region = 92 }

</bundles_post_ra>
